<compile_context>
chip_gen: v5e
topology: v5e:2x2
jax: 0.10.0
libtpu: 0.0.40
codegen_flags: <defaults>
</compile_context>

<pallas_src>
import functools

import jax
import jax.numpy as jnp
from jax import lax
from jax.experimental import pallas as pl
from jax.experimental.pallas import tpu as pltpu


# ----------------------------------------------------------------------------
# Fused kernel
# ----------------------------------------------------------------------------
def _bottleneck_kernel(*refs, has_pw1, has_halo, th, cmid, wcin, wcmid):
    idx = 0
    x_ref = refs[idx]; idx += 1
    if has_halo:
        xt_ref, xb_ref = refs[idx], refs[idx + 1]; idx += 2
    if has_pw1:
        w1_ref, b1_ref = refs[idx], refs[idx + 1]; idx += 2
    wd_ref, bd_ref, w2_ref, b2_ref, o_ref = refs[idx:idx + 5]

    x_c = x_ref[...].reshape(th, wcin)          # (TH, W*Cin), lane-dense
    x_c32 = x_c.astype(jnp.float32)             # residual (computed once)

    # --- pw1: 1x1 conv (+ folded BN scale) as ONE block-diagonal MXU matmul,
    #     over the whole (TH+2)-row slab when halos are present. -------------
    if has_halo:
        x_slab = jnp.concatenate(
            [xt_ref[...].reshape(1, wcin), x_c, xb_ref[...].reshape(1, wcin)],
            axis=0)                              # (TH+2, W*Cin)
        if has_pw1:
            w1 = w1_ref[...]
            h = jnp.dot(x_slab.astype(w1.dtype), w1,
                        preferred_element_type=jnp.float32)
            h = jnp.clip(h + b1_ref[...], 0.0, 6.0)        # BN shift + ReLU6
        else:
            h = x_slab.astype(jnp.float32)
        # The dw conv's zero padding applies to the dw INPUT (post-pw1):
        # zero the halo rows that fall outside the image.
        t = pl.program_id(1)
        nt = pl.num_programs(1)
        rid = lax.broadcasted_iota(jnp.int32, (th + 2, 1), 0)
        keep = jnp.where(rid == 0, (t > 0).astype(jnp.float32),
                         jnp.where(rid == th + 1,
                                   (t < nt - 1).astype(jnp.float32), 1.0))
        h = h * keep                              # (TH+2, W*Cmid)
    else:
        if has_pw1:
            w1 = w1_ref[...]
            hc = jnp.dot(x_c.astype(w1.dtype), w1,
                         preferred_element_type=jnp.float32)
            hc = jnp.clip(hc + b1_ref[...], 0.0, 6.0)
        else:
            hc = x_c32
        zrow = jnp.zeros((1, wcmid), jnp.float32)
        h = jnp.concatenate([zrow, hc, zrow], axis=0)       # (TH+2, W*Cmid)

    # --- depthwise 3x3 (+ folded BN scale) on the lane-dense slab. ----------
    # kw = +/-1 taps are lane rolls by Cmid (XLU); their wrap-around and the
    # W-edge zero padding are handled by zeroed lanes in the tiled weights.
    h_l = pltpu.roll(h, cmid, 1)                 # neighbour at w-1
    h_r = pltpu.roll(h, wcmid - cmid, 1)         # neighbour at w+1
    wd = wd_ref[...]                             # (9, W*Cmid), masked + tiled
    acc = (h_l[0:th] * wd[0:1] + h[0:th] * wd[1:2] + h_r[0:th] * wd[2:3]
           + h_l[1:th + 1] * wd[3:4] + h[1:th + 1] * wd[4:5]
           + h_r[1:th + 1] * wd[5:6]
           + h_l[2:th + 2] * wd[6:7] + h[2:th + 2] * wd[7:8]
           + h_r[2:th + 2] * wd[8:9])
    y = jnp.clip(acc + bd_ref[...], 0.0, 6.0)    # (TH, W*Cmid)

    # --- pw2: 1x1 conv (+ folded BN scale) as one block-diagonal MXU matmul,
    #     BN shift, residual add, lane-dense store. --------------------------
    w2 = w2_ref[...]
    z = jnp.dot(y.astype(w2.dtype), w2, preferred_element_type=jnp.float32)
    out = z + b2_ref[...] + x_c32
    o_ref[...] = out.reshape(o_ref.shape).astype(o_ref.dtype)


# ----------------------------------------------------------------------------
# VMEM-budget-based tile selection
# ----------------------------------------------------------------------------
def _vmem_estimate(th, w, cin, cmid, x_bytes, has_pw1):
    wcin, wcmid = w * cin, w * cmid
    tile_io = 2 * 2 * (th * wcin * x_bytes)            # in + out, double-buffered
    halo = 2 * 2 * (wcin * x_bytes)                    # two halo rows
    weights = ((wcin * wcmid * 4 if has_pw1 else 0) + wcmid * wcin * 4
               + 9 * wcmid * 4 + 2 * (wcmid + wcin) * 4)
    live = 8 * (th + 2) * wcmid * 4                    # h, rolls, acc, y headroom
    return tile_io + halo + weights + live


def _pick_tile_h(H, W, cin, cmid, n_batch, x_bytes, has_pw1,
                 budget_bytes=24 << 20):
    """Largest H-divisor tile under a v7x-safe VMEM budget (64 MiB/TC)."""
    candidates = [th for th in range(H, 0, -1) if H % th == 0]
    fitting = [th for th in candidates
               if _vmem_estimate(th, W, cin, cmid, x_bytes, has_pw1)
               <= budget_bytes]
    th = fitting[0] if fitting else 1
    # Dual-TC chips (v7x): make sure the (N, H-tiles) grid has >= 2 steps.
    if n_batch * (H // th) < 2:
        smaller = [c for c in fitting if c < th]
        if smaller:
            th = smaller[0]
    return th


# ----------------------------------------------------------------------------
# Pallas wrapper
# ----------------------------------------------------------------------------
def _bottleneck_fused(x, w1bd, b1t, wdt, bdt, w2bd, b2t, *,
                      h, w, cin, cmid, tile_h):
    N = x.shape[0]
    wcin, wcmid = w * cin, w * cmid
    TH = tile_h
    HT = h // TH
    has_pw1 = w1bd is not None
    has_halo = HT > 1

    def xc_map(n, t): return (n, t, 0, 0)

    def xt_map(n, t): return (n, jnp.maximum(t * TH - 1, 0), 0, 0)

    def xb_map(n, t): return (n, jnp.minimum(t * TH + TH, h - 1), 0, 0)

    def w_map(n, t): return (0, 0)

    in_specs = [pl.BlockSpec((1, TH, 1, wcin), xc_map)]
    args = [x]
    if has_halo:
        in_specs += [pl.BlockSpec((1, 1, 1, wcin), xt_map),
                     pl.BlockSpec((1, 1, 1, wcin), xb_map)]
        args += [x, x]
    if has_pw1:
        in_specs += [pl.BlockSpec((wcin, wcmid), w_map),
                     pl.BlockSpec((1, wcmid), w_map)]
        args += [w1bd, b1t]
    in_specs += [pl.BlockSpec((9, wcmid), w_map),
                 pl.BlockSpec((1, wcmid), w_map),
                 pl.BlockSpec((wcmid, wcin), w_map),
                 pl.BlockSpec((1, wcin), w_map)]
    args += [wdt, bdt, w2bd, b2t]
    # TODO(synk): weight blocks have constant index maps; pipeline_mode=
    # pl.Buffered(1) would drop their second buffer (minor VMEM saving).

    kernel = functools.partial(_bottleneck_kernel, has_pw1=has_pw1,
                               has_halo=has_halo, th=TH, cmid=cmid,
                               wcin=wcin, wcmid=wcmid)
    vmem_est = _vmem_estimate(TH, w, cin, cmid, x.dtype.itemsize, has_pw1)
    vmem_limit = int(min(max(4 * vmem_est, 16 << 20), 32 << 20))

    return pl.pallas_call(
        kernel,
        out_shape=jax.ShapeDtypeStruct((N, h, 1, wcin), x.dtype),
        grid_spec=pltpu.PrefetchScalarGridSpec(
            num_scalar_prefetch=0, grid=(N, HT),
            in_specs=in_specs,
            out_specs=pl.BlockSpec((1, TH, 1, wcin), xc_map)),
        compiler_params=pltpu.CompilerParams(
            dimension_semantics=("parallel", "parallel"),
            vmem_limit_bytes=vmem_limit),
    )(*args)


# ----------------------------------------------------------------------------
# Parameter init (deterministic, synthetic), forward, and pure-JAX reference
# ----------------------------------------------------------------------------
_BN_EPS = 1e-5


def _fold_bn(gamma, beta, mean, var):
    scale = gamma / jnp.sqrt(var + _BN_EPS)
    shift = beta - mean * scale
    return scale[None, :], shift[None, :]          # (1, C)


def init_bottleneck_params(key, in_channels, mid_channels):
    ks = jax.random.split(key, 6)

    def bn(k, c):
        k1, k2, k3, k4 = jax.random.split(k, 4)
        gamma = 1.0 + 0.1 * jax.random.normal(k1, (c,), jnp.float32)
        beta = 0.1 * jax.random.normal(k2, (c,), jnp.float32)
        mean = 0.1 * jax.random.normal(k3, (c,), jnp.float32)
        var = 0.5 + jnp.abs(jax.random.normal(k4, (c,), jnp.float32))
        return gamma, beta, mean, var

    p = {}
    # pw1: Conv2d(in, mid, 1, bias=False) + BN + ReLU6
    p["w_pw1"] = 0.1 * jax.random.normal(ks[0], (in_channels, mid_channels),
                                         jnp.float32)
    p["pw1_scale"], p["pw1_shift"] = _fold_bn(*bn(ks[1], mid_channels))
    # dw: Conv2d(mid, mid, 3, pad=1, groups=mid, bias=False) + BN + ReLU6
    p["w_dw_hwio"] = 0.1 * jax.random.normal(ks[2], (3, 3, 1, mid_channels),
                                             jnp.float32)
    p["dw_scale"], p["dw_shift"] = _fold_bn(*bn(ks[3], mid_channels))
    # pw2: Conv2d(mid, in, 1, bias=False) + BN
    p["w_pw2"] = 0.1 * jax.random.normal(ks[4], (mid_channels, in_channels),
                                         jnp.float32)
    p["pw2_scale"], p["pw2_shift"] = _fold_bn(*bn(ks[5], in_channels))
    return p


@functools.partial(jax.jit,
                   static_argnames=("cin", "cmid", "tile_h", "mxu_dtype"))
def bottleneck_forward(x_nchw, p, *, cin, cmid, tile_h=None,
                       mxu_dtype=jnp.bfloat16):
    """Pallas implementation.  Input/output NCHW like PyTorch."""
    N, C, H, W = x_nchw.shape
    wcin, wcmid = W * cin, W * cmid
    # NCHW -> lane-dense (N, H, 1, W*C).  Pure layout plumbing outside kernel.
    # TODO(synk): in a full network keep activations in this layout across
    # layers so the NCHW<->NHWC transposes leave the hot path entirely.
    x = jnp.transpose(x_nchw, (0, 2, 3, 1)).reshape(N, H, 1, wcin)

    has_pw1 = cmid != cin
    eye = jnp.eye(W, dtype=jnp.float32)

    # Fold BN scales into the conv weights (exact) and build block-diagonal /
    # W-tiled versions so the kernel works on lane-dense slabs with deep-K
    # MXU contractions and no in-kernel reshapes.
    # TODO(synk): for large W*C (>~2k lanes) the block-diagonal weights grow
    # quadratically; fall back to a narrow-K (rows*W, C) formulation there.
    if has_pw1:
        w1 = p["w_pw1"] * p["pw1_scale"]                     # (Cin, Cmid)
        w1bd = jnp.kron(eye, w1).astype(mxu_dtype)           # (W*Cin, W*Cmid)
        b1t = jnp.tile(p["pw1_shift"], (1, W))               # (1, W*Cmid) f32
    else:
        w1bd = b1t = None

    wd = p["w_dw_hwio"].reshape(9, cmid) * p["dw_scale"]     # (9, Cmid)
    wdt = jnp.tile(wd, (1, W))                               # (9, W*Cmid)
    # Fold the W-edge zero padding (and lane-roll wrap-around) into the tiled
    # dw weights: kw=0 taps are invalid at w==0, kw=2 taps at w==W-1.
    lane = jnp.arange(wcmid)
    keep_l = (lane >= cmid).astype(jnp.float32)
    keep_r = (lane < wcmid - cmid).astype(jnp.float32)
    kw_col = jnp.arange(9) % 3
    tap_mask = jnp.where(kw_col[:, None] == 0, keep_l[None, :],
                         jnp.where(kw_col[:, None] == 2, keep_r[None, :], 1.0))
    wdt = wdt * tap_mask
    bdt = jnp.tile(p["dw_shift"], (1, W))                    # (1, W*Cmid) f32

    w2 = p["w_pw2"] * p["pw2_scale"]                         # (Cmid, Cin)
    w2bd = jnp.kron(eye, w2).astype(mxu_dtype)               # (W*Cmid, W*Cin)
    b2t = jnp.tile(p["pw2_shift"], (1, W))                   # (1, W*Cin) f32

    th = tile_h if tile_h is not None else _pick_tile_h(
        H, W, cin, cmid, N, x.dtype.itemsize, has_pw1)
    assert H % th == 0, "tile_h must divide H"

    out = _bottleneck_fused(x, w1bd, b1t, wdt, bdt, w2bd, b2t,
                            h=H, w=W, cin=cin, cmid=cmid, tile_h=th)
    return jnp.transpose(out.reshape(N, H, W, cin), (0, 3, 1, 2))


def bottleneck_reference(x_nchw, p, *, cin, cmid):
    """Pure-JAX reference (lax.conv) for correctness checking."""
    x = jnp.transpose(x_nchw, (0, 2, 3, 1))
    dn = ("NHWC", "HWIO", "NHWC")
    out = x
    if cmid != cin:
        out = lax.conv_general_dilated(out, p["w_pw1"].reshape(1, 1, cin, cmid),
                                       (1, 1), "VALID", dimension_numbers=dn)
        out = out * p["pw1_scale"][0] + p["pw1_shift"][0]
        out = jnp.clip(out, 0.0, 6.0)
    out = lax.conv_general_dilated(out, p["w_dw_hwio"], (1, 1),
                                   ((1, 1), (1, 1)), dimension_numbers=dn,
                                   feature_group_count=cmid)
    out = out * p["dw_scale"][0] + p["dw_shift"][0]
    out = jnp.clip(out, 0.0, 6.0)
    out = lax.conv_general_dilated(out, p["w_pw2"].reshape(1, 1, cmid, cin),
                                   (1, 1), "VALID", dimension_numbers=dn)
    out = out * p["pw2_scale"][0] + p["pw2_shift"][0]
    out = out + x
    return jnp.transpose(out, (0, 3, 1, 2))


if __name__ == "__main__":
    key = jax.random.PRNGKey(0)
    kx, kp1, kp2 = jax.random.split(key, 3)

    N, C, H, W = 2, 16, 16, 16
    x = jax.random.normal(kx, (N, C, H, W), jnp.float32)

    # Config 1: mid == in (dw -> pw2 -> +identity)
    params = init_bottleneck_params(kp1, C, C)
    ref = bottleneck_reference(x, params, cin=C, cmid=C)
    # f32 MXU path, whole-image tile (no halos): tight semantic check.
    out = jax.block_until_ready(
        bottleneck_forward(x, params, cin=C, cmid=C, mxu_dtype=jnp.float32))
    assert out.shape == (N, C, H, W)
    assert jnp.allclose(out, ref, atol=1e-3, rtol=1e-3)
    # bf16 MXU path, H-tiled (halo path exercised).
    out_b = jax.block_until_ready(
        bottleneck_forward(x, params, cin=C, cmid=C, tile_h=8))
    assert jnp.allclose(out_b, ref, atol=3e-2, rtol=3e-2)

    # Config 2: mid != in (pw1 -> dw -> pw2 -> +identity)
    Cmid = 32
    params2 = init_bottleneck_params(kp2, C, Cmid)
    ref2 = bottleneck_reference(x, params2, cin=C, cmid=Cmid)
    out2 = jax.block_until_ready(
        bottleneck_forward(x, params2, cin=C, cmid=Cmid, tile_h=8,
                           mxu_dtype=jnp.float32))
    assert jnp.allclose(out2, ref2, atol=1e-3, rtol=1e-3)
    out2b = jax.block_until_ready(
        bottleneck_forward(x, params2, cin=C, cmid=Cmid))
    assert jnp.allclose(out2b, ref2, atol=3e-2, rtol=3e-2)

    print("KERNEL_OK")
</pallas_src>

<mosaic_0001>
module attributes {stable_mosaic.version = 11 : i64} {
  func.func @_bottleneck_kernel(%arg0: i32, %arg1: i32, %arg2: memref<1x16x1x256xf32, #tpu.memory_space<vmem>>, %arg3: memref<9x256xf32, #tpu.memory_space<vmem>>, %arg4: memref<1x256xf32, #tpu.memory_space<vmem>>, %arg5: memref<256x256xf32, #tpu.memory_space<vmem>>, %arg6: memref<1x256xf32, #tpu.memory_space<vmem>>, %arg7: memref<1x16x1x256xf32, #tpu.memory_space<vmem>>) attributes {dimension_semantics = [#tpu.dimension_semantics<parallel>, #tpu.dimension_semantics<parallel>], iteration_bounds = array<i64: 2, 1>, scalar_prefetch = 0 : i64, scratch_operands = 0 : i64, tpu.core_type = #tpu.core_type<tc>, window_params = [{transform_indices = @transform_0, window_bounds = array<i64: 1, 16, 1, 256>}, {pipeline_mode = #tpu.pipeline_mode<synchronous>, transform_indices = @transform_1, window_bounds = array<i64: 9, 256>}, {pipeline_mode = #tpu.pipeline_mode<synchronous>, transform_indices = @transform_2, window_bounds = array<i64: 1, 256>}, {pipeline_mode = #tpu.pipeline_mode<synchronous>, transform_indices = @transform_3, window_bounds = array<i64: 256, 256>}, {pipeline_mode = #tpu.pipeline_mode<synchronous>, transform_indices = @transform_4, window_bounds = array<i64: 1, 256>}, {transform_indices = @transform_5, window_bounds = array<i64: 1, 16, 1, 256>}]} {
    %c0 = arith.constant 0 : index
    %c0_0 = arith.constant 0 : index
    %c0_1 = arith.constant 0 : index
    %c0_2 = arith.constant 0 : index
    %0 = vector.load %arg2[%c0, %c0_0, %c0_1, %c0_2] : memref<1x16x1x256xf32, #tpu.memory_space<vmem>>, vector<1x16x1x256xf32>
    %1 = vector.shape_cast %0 : vector<1x16x1x256xf32> to vector<16x256xf32>
    %cst = arith.constant 0.000000e+00 : f32
    %2 = vector.broadcast %cst : f32 to vector<1x256xf32>
    %3 = tpu.concatenate %2, %1, %2 in 0 : vector<1x256xf32>, vector<16x256xf32>, vector<1x256xf32> -> vector<18x256xf32>
    %c16_i32 = arith.constant 16 : i32
    %4 = tpu.dynamic_rotate %3 by %c16_i32 dim 1 : vector<18x256xf32>, i32 -> vector<18x256xf32>
    %c240_i32 = arith.constant 240 : i32
    %5 = tpu.dynamic_rotate %3 by %c240_i32 dim 1 : vector<18x256xf32>, i32 -> vector<18x256xf32>
    %c0_3 = arith.constant 0 : index
    %c0_4 = arith.constant 0 : index
    %6 = vector.load %arg3[%c0_3, %c0_4] : memref<9x256xf32, #tpu.memory_space<vmem>>, vector<9x256xf32>
    %7 = vector.extract_strided_slice %4 {offsets = [0, 0], sizes = [16, 256], strides = [1, 1]} : vector<18x256xf32> to vector<16x256xf32>
    %8 = vector.extract_strided_slice %6 {offsets = [0, 0], sizes = [1, 256], strides = [1, 1]} : vector<9x256xf32> to vector<1x256xf32>
    %9 = vector.broadcast %8 : vector<1x256xf32> to vector<16x256xf32>
    %10 = arith.mulf %7, %9 : vector<16x256xf32>
    %11 = vector.extract_strided_slice %3 {offsets = [0, 0], sizes = [16, 256], strides = [1, 1]} : vector<18x256xf32> to vector<16x256xf32>
    %12 = vector.extract_strided_slice %6 {offsets = [1, 0], sizes = [1, 256], strides = [1, 1]} : vector<9x256xf32> to vector<1x256xf32>
    %13 = vector.broadcast %12 : vector<1x256xf32> to vector<16x256xf32>
    %14 = arith.mulf %11, %13 : vector<16x256xf32>
    %15 = arith.addf %10, %14 : vector<16x256xf32>
    %16 = vector.extract_strided_slice %5 {offsets = [0, 0], sizes = [16, 256], strides = [1, 1]} : vector<18x256xf32> to vector<16x256xf32>
    %17 = vector.extract_strided_slice %6 {offsets = [2, 0], sizes = [1, 256], strides = [1, 1]} : vector<9x256xf32> to vector<1x256xf32>
    %18 = vector.broadcast %17 : vector<1x256xf32> to vector<16x256xf32>
    %19 = arith.mulf %16, %18 : vector<16x256xf32>
    %20 = arith.addf %15, %19 : vector<16x256xf32>
    %21 = vector.extract_strided_slice %4 {offsets = [1, 0], sizes = [16, 256], strides = [1, 1]} : vector<18x256xf32> to vector<16x256xf32>
    %22 = vector.extract_strided_slice %6 {offsets = [3, 0], sizes = [1, 256], strides = [1, 1]} : vector<9x256xf32> to vector<1x256xf32>
    %23 = vector.broadcast %22 : vector<1x256xf32> to vector<16x256xf32>
    %24 = arith.mulf %21, %23 : vector<16x256xf32>
    %25 = arith.addf %20, %24 : vector<16x256xf32>
    %26 = vector.extract_strided_slice %3 {offsets = [1, 0], sizes = [16, 256], strides = [1, 1]} : vector<18x256xf32> to vector<16x256xf32>
    %27 = vector.extract_strided_slice %6 {offsets = [4, 0], sizes = [1, 256], strides = [1, 1]} : vector<9x256xf32> to vector<1x256xf32>
    %28 = vector.broadcast %27 : vector<1x256xf32> to vector<16x256xf32>
    %29 = arith.mulf %26, %28 : vector<16x256xf32>
    %30 = arith.addf %25, %29 : vector<16x256xf32>
    %31 = vector.extract_strided_slice %5 {offsets = [1, 0], sizes = [16, 256], strides = [1, 1]} : vector<18x256xf32> to vector<16x256xf32>
    %32 = vector.extract_strided_slice %6 {offsets = [5, 0], sizes = [1, 256], strides = [1, 1]} : vector<9x256xf32> to vector<1x256xf32>
    %33 = vector.broadcast %32 : vector<1x256xf32> to vector<16x256xf32>
    %34 = arith.mulf %31, %33 : vector<16x256xf32>
    %35 = arith.addf %30, %34 : vector<16x256xf32>
    %36 = vector.extract_strided_slice %4 {offsets = [2, 0], sizes = [16, 256], strides = [1, 1]} : vector<18x256xf32> to vector<16x256xf32>
    %37 = vector.extract_strided_slice %6 {offsets = [6, 0], sizes = [1, 256], strides = [1, 1]} : vector<9x256xf32> to vector<1x256xf32>
    %38 = vector.broadcast %37 : vector<1x256xf32> to vector<16x256xf32>
    %39 = arith.mulf %36, %38 : vector<16x256xf32>
    %40 = arith.addf %35, %39 : vector<16x256xf32>
    %41 = vector.extract_strided_slice %3 {offsets = [2, 0], sizes = [16, 256], strides = [1, 1]} : vector<18x256xf32> to vector<16x256xf32>
    %42 = vector.extract_strided_slice %6 {offsets = [7, 0], sizes = [1, 256], strides = [1, 1]} : vector<9x256xf32> to vector<1x256xf32>
    %43 = vector.broadcast %42 : vector<1x256xf32> to vector<16x256xf32>
    %44 = arith.mulf %41, %43 : vector<16x256xf32>
    %45 = arith.addf %40, %44 : vector<16x256xf32>
    %46 = vector.extract_strided_slice %5 {offsets = [2, 0], sizes = [16, 256], strides = [1, 1]} : vector<18x256xf32> to vector<16x256xf32>
    %47 = vector.extract_strided_slice %6 {offsets = [8, 0], sizes = [1, 256], strides = [1, 1]} : vector<9x256xf32> to vector<1x256xf32>
    %48 = vector.broadcast %47 : vector<1x256xf32> to vector<16x256xf32>
    %49 = arith.mulf %46, %48 : vector<16x256xf32>
    %50 = arith.addf %45, %49 : vector<16x256xf32>
    %c0_5 = arith.constant 0 : index
    %c0_6 = arith.constant 0 : index
    %51 = vector.load %arg4[%c0_5, %c0_6] : memref<1x256xf32, #tpu.memory_space<vmem>>, vector<1x256xf32>
    %52 = vector.broadcast %51 : vector<1x256xf32> to vector<16x256xf32>
    %53 = arith.addf %50, %52 : vector<16x256xf32>
    %cst_7 = arith.constant 0.000000e+00 : f32
    %cst_8 = arith.constant 6.000000e+00 : f32
    %54 = vector.broadcast %cst_7 : f32 to vector<16x256xf32>
    %55 = arith.maximumf %54, %53 : vector<16x256xf32>
    %56 = vector.broadcast %cst_8 : f32 to vector<16x256xf32>
    %57 = arith.minimumf %56, %55 : vector<16x256xf32>
    %c0_9 = arith.constant 0 : index
    %c0_10 = arith.constant 0 : index
    %58 = vector.load %arg5[%c0_9, %c0_10] : memref<256x256xf32, #tpu.memory_space<vmem>>, vector<256x256xf32>
    %cst_11 = arith.constant dense<0.000000e+00> : vector<16x256xf32>
    %59 = tpu.matmul %57, %58, %cst_11 {dimension_numbers = #tpu.dot_dimension_numbers<[1], [0], [0], [1], [0, 0, 1, 1], [], []>} : vector<16x256xf32>, vector<256x256xf32>, vector<16x256xf32> -> vector<16x256xf32>
    %c0_12 = arith.constant 0 : index
    %c0_13 = arith.constant 0 : index
    %60 = vector.load %arg6[%c0_12, %c0_13] : memref<1x256xf32, #tpu.memory_space<vmem>>, vector<1x256xf32>
    %61 = vector.broadcast %60 : vector<1x256xf32> to vector<16x256xf32>
    %62 = arith.addf %59, %61 : vector<16x256xf32>
    %63 = arith.addf %62, %1 : vector<16x256xf32>
    %64 = vector.shape_cast %63 : vector<16x256xf32> to vector<1x16x1x256xf32>
    %c0_14 = arith.constant 0 : index
    %c0_15 = arith.constant 0 : index
    %c0_16 = arith.constant 0 : index
    %c0_17 = arith.constant 0 : index
    %65 = vector.load %arg7[%c0_14, %c0_15, %c0_16, %c0_17] : memref<1x16x1x256xf32, #tpu.memory_space<vmem>>, vector<1x16x1x256xf32>
    tpu.vector_store %arg7[%c0_14, %c0_15, %c0_16, %c0_17], %64 {strides = array<i32>} : memref<1x16x1x256xf32, #tpu.memory_space<vmem>>, vector<1x16x1x256xf32>,
    return
  }
  func.func @transform_0(%arg0: i32, %arg1: i32) -> (i32, i32, i32, i32) {
    %c0_i32 = arith.constant 0 : i32
    %c0_i32_0 = arith.constant 0 : i32
    %c0_i32_1 = arith.constant 0 : i32
    return %arg0, %arg1, %c0_i32, %c0_i32_0 : i32, i32, i32, i32
  }
  func.func @transform_1(%arg0: i32, %arg1: i32) -> (i32, i32) {
    %c0_i32 = arith.constant 0 : i32
    %c0_i32_0 = arith.constant 0 : i32
    %c0_i32_1 = arith.constant 0 : i32
    return %c0_i32, %c0_i32_0 : i32, i32
  }
  func.func @transform_2(%arg0: i32, %arg1: i32) -> (i32, i32) {
    %c0_i32 = arith.constant 0 : i32
    %c0_i32_0 = arith.constant 0 : i32
    %c0_i32_1 = arith.constant 0 : i32
    return %c0_i32, %c0_i32_0 : i32, i32
  }
  func.func @transform_3(%arg0: i32, %arg1: i32) -> (i32, i32) {
    %c0_i32 = arith.constant 0 : i32
    %c0_i32_0 = arith.constant 0 : i32
    %c0_i32_1 = arith.constant 0 : i32
    return %c0_i32, %c0_i32_0 : i32, i32
  }
  func.func @transform_4(%arg0: i32, %arg1: i32) -> (i32, i32) {
    %c0_i32 = arith.constant 0 : i32
    %c0_i32_0 = arith.constant 0 : i32
    %c0_i32_1 = arith.constant 0 : i32
    return %c0_i32, %c0_i32_0 : i32, i32
  }
  func.func @transform_5(%arg0: i32, %arg1: i32) -> (i32, i32, i32, i32) {
    %c0_i32 = arith.constant 0 : i32
    %c0_i32_0 = arith.constant 0 : i32
    %c0_i32_1 = arith.constant 0 : i32
    return %arg0, %arg1, %c0_i32, %c0_i32_0 : i32, i32, i32, i32
  }
}

</mosaic_0001>

<bundles_post_ra>
// kernel: tile.19
= control target key start
LH: loop header
LB: loop body
LE: loop exit
PB: predicated region body
PF: predicated region fallthrough
CT: control target
= control target key end

     0   :  { %s81_s6 = smov 3  ;;  %s36_s9 = smov 3  ;;  %vm41_vm0 = vcmask 1043458   ;;  %vm46_vm1 = vcmask 1045508   ;;  %vm51_vm2 = vcmask 1047558   ;;  %vm4_vm3 = vcmask 1047556   ;;  %s878_s0 = inlined_call_operand.vmem [shape: f32[9,16,16], index: 0, kind: input, shape index: {}]   ;;  %s879_s1 = inlined_call_operand.vmem [shape: f32[9,256], index: 1, kind: output, shape index: {}]  }
   0x1   :  { %v426_v0 = vld [vmem:[%s878_s0 + $0x87] ss:$8 sm:%s81_s6]   ;;  %s39_s10 = smov 12  ;;  %s501_s11 = smov 112   ;;  %vm6_vm4 = vcmask 130048   ;;  %vm55_vm5 = vcmask 1048448  }
   0x2   :  { %83 = vrot.lane.b32.xlu1 %v426_v0, %s501_s11  ;;  %v417_v1 = vld [vmem:[%s878_s0 + $0x7] ss:$16 sm:%s36_s9]   ;;  %s44_s14 = smov 48  ;;  %s49_s15 = smov 192  ;;  %vm108_vm6 = vcmask 917248   ;;  %vm161_vm7 = vcmask 786048  }
   0x3   :  { %v418_v2 = vld [vmem:[%s878_s0 + $0x7] ss:$16 sm:%s39_s10]   ;;  %s89_s20 = smov 3  ;;  %s92_s21 = smov 12  ;;  %vm214_vm8 = vcmask 654848   ;;  %vm267_vm9 = vcmask 523648  }
   0x4   :  { %v419_v3 = vld [vmem:[%s878_s0 + $0x7] ss:$16 sm:%s44_s14]   ;;  %v42_v4 = vsel %vm41_vm0, %v418_v2, %v417_v1  ;;  %v428_v6 = vld [vmem:[%s878_s0 + $0x6] ss:$16 sm:%s89_s20]   ;;  %s97_s26 = smov 48  ;;  %s102_s27 = smov 192 }
   0x5   :  { %v420_v5 = vld [vmem:[%s878_s0 + $0x7] ss:$16 sm:%s49_s15]   ;;  %v47_v7 = vsel %vm46_vm1, %v419_v3, %v42_v4  ;;  %v429_v8 = vld [vmem:[%s878_s0 + $0x6] ss:$16 sm:%s92_s21]   ;;  %s58_s3 = smov 3  ;;  %s61_s8 = smov 12 }
   0x6   :  { %v430_v9 = vld [vmem:[%s878_s0 + $0x6] ss:$16 sm:%s97_s26]   ;;  %v52_v10 = vsel %vm51_vm2, %v420_v5, %v47_v7  ;;  %v95_v11 = vsel %vm41_vm0, %v429_v8, %v428_v6  ;;  %v421_v13 = vld [vmem:[%s878_s0 + $0xf] ss:$16 sm:%s58_s3]   ;;  %s66_s9 = smov 48  ;;  %s71_s13 = smov 192 }
   0x7   :  { %v431_v12 = vld [vmem:[%s878_s0 + $0x6] ss:$16 sm:%s102_s27]   ;;  %53 = vrot.lane.b32.xlu0 %v52_v10, %s501_s11  ;;  %v100_v14 = vsel %vm46_vm1, %v430_v9, %v95_v11  ;;  %s164_s18 = smov 3  ;;  %s167_s19 = smov 12  ;;  %vm320_vm10 = vcmask 392448   ;;  %vm373_vm11 = vcmask 261248  }
   0x8   :  { %v422_v15 = vld [vmem:[%s878_s0 + $0xf] ss:$16 sm:%s61_s8]   ;;  %v105_v16 = vsel %vm51_vm2, %v431_v12, %v100_v14  ;;  %v443_v21 = vld [vmem:[%s878_s0 + $0xd] ss:$16 sm:%s164_s18]   ;;  %s172_s24 = smov 48  ;;  %s177_s25 = smov 192 }
   0x9   :  { %v64_v17 = vsel %vm41_vm0, %v422_v15, %v421_v13  ;;  %v423_v18 = vld [vmem:[%s878_s0 + $0xf] ss:$16 sm:%s66_s9]   ;;  %v444_v22 = vld [vmem:[%s878_s0 + $0xd] ss:$16 sm:%s167_s19]   ;;  %s502_s26 = smov 96   ;;  %s142_s29 = smov 3 }
   0xa   :  { %v424_v19 = vld [vmem:[%s878_s0 + $0xf] ss:$16 sm:%s71_s13]   ;;  %v69_v20 = vsel %vm46_vm1, %v423_v18, %v64_v17  ;;  %106 = vrot.lane.b32.xlu1 %v105_v16, %s502_s26  ;;  %v170_v23 = vsel %vm41_vm0, %v444_v22, %v443_v21  ;;  %s145_s30 = smov 12  ;;  %s150_s4 = smov 48 }
   0xb   :  { %v445_v24 = vld [vmem:[%s878_s0 + $0xd] ss:$16 sm:%s172_s24]   ;;  %v439_v25 = vld [vmem:[%s878_s0 + $0x5] ss:$16 sm:%s142_s29]   ;;  %v74_v26 = vsel %vm51_vm2, %v424_v19, %v69_v20  ;;  %s111_s9 = smov 3  ;;  %s114_s10 = smov 12 }
   0xc   :  { %v175_v27 = vsel %vm46_vm1, %v445_v24, %v170_v23  ;;  %v446_v28 = vld [vmem:[%s878_s0 + $0xd] ss:$16 sm:%s177_s25]   ;;  %v440_v29 = vld [vmem:[%s878_s0 + $0x5] ss:$16 sm:%s145_s30]   ;;  %s119_s16 = smov 48  ;;  %s124_s17 = smov 192 }
   0xd   :  { %v441_v30 = vld [vmem:[%s878_s0 + $0x5] ss:$16 sm:%s150_s4]   ;;  %v432_v31 = vld [vmem:[%s878_s0 + $0xe] ss:$16 sm:%s111_s9]   ;;  %v148_v32 = vsel %vm41_vm0, %v440_v29, %v439_v25  ;;  %s155_s18 = smov 192  ;;  %s217_s23 = smov 3  ;;  %v180_v35 = vsel %vm51_vm2, %v446_v28, %v175_v27 }
   0xe   :  { %v433_v33 = vld [vmem:[%s878_s0 + $0xe] ss:$16 sm:%s114_s10]   ;;  %s220_s25 = smov 12  ;;  %s225_s27 = smov 48  ;;  %v454_v39 = vld [vmem:[%s878_s0 + $0xc] ss:$16 sm:%s217_s23]   ;;  %v153_v41 = vsel %vm46_vm1, %v441_v30, %v148_v32 }
   0xf   :  { %v434_v34 = vld [vmem:[%s878_s0 + $0xe] ss:$16 sm:%s119_s16]   ;;  %75 = vrot.lane.b32.xlu0 %v74_v26, %s501_s11  ;;  %v117_v36 = vsel %vm41_vm0, %v433_v33, %v432_v31  ;;  %s195_s3 = smov 3  ;;  %s230_s8 = smov 192 }
  0x10   :  { %v435_v37 = vld [vmem:[%s878_s0 + $0xe] ss:$16 sm:%s124_s17]   ;;  %v122_v38 = vsel %vm46_vm1, %v434_v34, %v117_v36  ;;  %v455_v40 = vld [vmem:[%s878_s0 + $0xc] ss:$16 sm:%s220_s25]   ;;  %s198_s9 = smov 12  ;;  %s503_s10 = smov 80  }
  0x11   :  { %v442_v42 = vld [vmem:[%s878_s0 + $0x5] ss:$16 sm:%s155_s18]   ;;  %v127_v43 = vsel %vm51_vm2, %v435_v37, %v122_v38  ;;  %v223_v44 = vsel %vm41_vm0, %v455_v40, %v454_v39  ;;  %v456_v45 = vld [vmem:[%s878_s0 + $0xc] ss:$16 sm:%s225_s27]   ;;  %s203_s12 = smov 48  ;;  %s270_s17 = smov 3 }
  0x12   :  { %181 = vrot.lane.b32.xlu1 %v180_v35, %s503_s10  ;;  %128 = vrot.lane.b32.xlu2 %v127_v43, %s502_s26  ;;  %v450_v46 = vld [vmem:[%s878_s0 + $0x4] ss:$16 sm:%s195_s3]   ;;  %v158_v48 = vsel %vm51_vm2, %v442_v42, %v153_v41  ;;  %v228_v49 = vsel %vm46_vm1, %v456_v45, %v223_v44  ;;  %s134_s20 = smov 3  ;;  %s273_s21 = smov 12 }
  0x13   :  { %v451_v47 = vld [vmem:[%s878_s0 + $0x4] ss:$16 sm:%s198_s9]   ;;  %v457_v50 = vld [vmem:[%s878_s0 + $0xc] ss:$16 sm:%s230_s8]   ;;  %s208_s11 = smov 192  ;;  %s278_s29 = smov 48 }
  0x14   :  { %v452_v51 = vld [vmem:[%s878_s0 + $0x4] ss:$16 sm:%s203_s12]   ;;  %v201_v52 = vsel %vm41_vm0, %v451_v47, %v450_v46  ;;  %v465_v53 = vld [vmem:[%s878_s0 + $0xb] ss:$16 sm:%s270_s17]   ;;  %v233_v55 = vsel %vm51_vm2, %v457_v50, %v228_v49  ;;  %s248_s3 = smov 3  ;;  %s251_s4 = smov 12 }
  0x15   :  { %v466_v54 = vld [vmem:[%s878_s0 + $0xb] ss:$16 sm:%s273_s21]   ;;  %v437_v56 = vld [vmem:[%s878_s0 + $0x86] ss:$8 sm:%s134_s20]   ;;  %v206_v57 = vsel %vm46_vm1, %v452_v51, %v201_v52  ;;  %s283_s9 = smov 192  ;;  %s504_s12 = smov 64  }
  0x16   :  { %v453_v58 = vld [vmem:[%s878_s0 + $0x4] ss:$16 sm:%s208_s11]   ;;  %v276_v59 = vsel %vm41_vm0, %v466_v54, %v465_v53  ;;  %v467_v60 = vld [vmem:[%s878_s0 + $0xb] ss:$16 sm:%s278_s29]   ;;  %s323_s17 = smov 3  ;;  %s326_s18 = smov 12 }
  0x17   :  { %159 = vrot.lane.b32.xlu0 %v158_v48, %s503_s10  ;;  %v461_v61 = vld [vmem:[%s878_s0 + $0x3] ss:$16 sm:%s248_s3]   ;;  %v211_v63 = vsel %vm51_vm2, %v453_v58, %v206_v57  ;;  %v281_v0 = vsel %vm46_vm1, %v467_v60, %v276_v59  ;;  %s187_s21 = smov 3  ;;  %s261_s11 = smov 192 }
  0x18   :  { %v462_v62 = vld [vmem:[%s878_s0 + $0x3] ss:$16 sm:%s251_s4]   ;;  %v468_v1 = vld [vmem:[%s878_s0 + $0xb] ss:$16 sm:%s283_s9]   ;;  %s331_s29 = smov 48  ;;  %s301_s3 = smov 3 }
  0x19   :  { %v254_v3 = vsel %vm41_vm0, %v462_v62, %v461_v61  ;;  %v476_v4 = vld [vmem:[%s878_s0 + $0xa] ss:$16 sm:%s323_s17]   ;;  %v286_v6 = vsel %vm51_vm2, %v468_v1, %v281_v0  ;;  %v448_v7 = vld [vmem:[%s878_s0 + $0x85] ss:$8 sm:%s187_s21]   ;;  %s304_s4 = smov 12  ;;  %s336_s9 = smov 192 }
  0x1a   :  { %234 = vrot.lane.b32.xlu1 %v233_v55, %s504_s12  ;;  %136 = vrot.lane.b32.xlu2 %v437_v56, %s502_s26  ;;  %s256_s26 = smov 48  ;;  %v477_v5 = vld [vmem:[%s878_s0 + $0xa] ss:$16 sm:%s326_s18]   ;;  %s376_s17 = smov 3 }
  0x1b   :  { %v463_v2 = vld [vmem:[%s878_s0 + $0x3] ss:$16 sm:%s256_s26]   ;;  %v329_v10 = vsel %vm41_vm0, %v477_v5, %v476_v4  ;;  %v478_v11 = vld [vmem:[%s878_s0 + $0xa] ss:$16 sm:%s331_s29]   ;;  %s505_s26 = smov 48   ;;  %s379_s18 = smov 12 }
  0x1c   :  { %v259_v8 = vsel %vm46_vm1, %v463_v2, %v254_v3  ;;  %v464_v9 = vld [vmem:[%s878_s0 + $0x3] ss:$16 sm:%s261_s11]   ;;  %v472_v12 = vld [vmem:[%s878_s0 + $0x2] ss:$16 sm:%s301_s3]   ;;  %v334_v15 = vsel %vm46_vm1, %v478_v11, %v329_v10  ;;  %s240_s21 = smov 3  ;;  %s314_s11 = smov 192 }
  0x1d   :  { %v473_v13 = vld [vmem:[%s878_s0 + $0x2] ss:$16 sm:%s304_s4]   ;;  %v264_v14 = vsel %vm51_vm2, %v464_v9, %v259_v8  ;;  %v479_v16 = vld [vmem:[%s878_s0 + $0xa] ss:$16 sm:%s336_s9]   ;;  %s384_s29 = smov 48  ;;  %s354_s3 = smov 3 }
  0x1e   :  { %v307_v18 = vsel %vm41_vm0, %v473_v13, %v472_v12  ;;  %v487_v19 = vld [vmem:[%s878_s0 + $0x9] ss:$16 sm:%s376_s17]   ;;  %v339_v21 = vsel %vm51_vm2, %v479_v16, %v334_v15  ;;  %v459_v22 = vld [vmem:[%s878_s0 + $0x84] ss:$8 sm:%s240_s21]   ;;  %s357_s4 = smov 12  ;;  %s389_s9 = smov 192 }
  0x1f   :  { %212 = vrot.lane.b32.xlu0 %v211_v63, %s504_s12  ;;  %v488_v20 = vld [vmem:[%s878_s0 + $0x9] ss:$16 sm:%s379_s18]   ;;  %s362_s16 = smov 48  ;;  %s293_s19 = smov 3 }
  0x20   :  { %v475_v24 = vld [vmem:[%s878_s0 + $0x2] ss:$16 sm:%s314_s11]   ;;  %v382_v25 = vsel %vm41_vm0, %v488_v20, %v487_v19  ;;  %v489_v26 = vld [vmem:[%s878_s0 + $0x9] ss:$16 sm:%s384_s29]   ;;  %s367_s22 = smov 192  ;;  %s507_s27 = smov 16  }
  0x21   :  { %v483_v27 = vld [vmem:[%s878_s0 + $0x1] ss:$16 sm:%s354_s3]   ;;  %v387_v30 = vsel %vm46_vm1, %v489_v26, %v382_v25  ;;  %v490_v31 = vld [vmem:[%s878_s0 + $0x9] ss:$16 sm:%s389_s9]   ;;  %s399_s30 = smov 3  ;;  %s30_s21 = smov 3 }
  0x22   :  { %287 = vrot.lane.b32.xlu1 %v286_v6, %s505_s26  ;;  %189 = vrot.lane.b32.xlu2 %v448_v7, %s503_s10  ;;  %s309_s10 = smov 48  ;;  %v484_v28 = vld [vmem:[%s878_s0 + $0x1] ss:$16 sm:%s357_s4]   ;;  %v392_v34 = vsel %vm51_vm2, %v490_v31, %v387_v30 }
  0x23   :  { %v474_v17 = vld [vmem:[%s878_s0 + $0x2] ss:$16 sm:%s309_s10]   ;;  %s506_s10 = smov 32   ;;  %v360_v32 = vsel %vm41_vm0, %v484_v28, %v483_v27  ;;  %v485_v33 = vld [vmem:[%s878_s0 + $0x1] ss:$16 sm:%s362_s16]  }
  0x24   :  { %v312_v23 = vsel %vm46_vm1, %v474_v17, %v307_v18  ;;  %v470_v35 = vld [vmem:[%s878_s0 + $0x83] ss:$8 sm:%s293_s19]   ;;  %v365_v36 = vsel %vm46_vm1, %v485_v33, %v360_v32  ;;  %v486_v37 = vld [vmem:[%s878_s0 + $0x1] ss:$16 sm:%s367_s22]  }
  0x25   :  { %v317_v29 = vsel %vm51_vm2, %v475_v24, %v312_v23  ;;  %v370_v38 = vsel %vm51_vm2, %v486_v37, %v365_v36  ;;  %v492_v40 = vld [vmem:[%s878_s0 + $0x81] ss:$8 sm:%s399_s30]   ;;  %v2_v41 = vld [vmem:[%s878_s0] ss:$8 sm:$0xf]  }
  0x26   :  { %v3_v42 = vld [vmem:[%s878_s0] ss:$8 sm:$0xf0]  }
  0x27   :  { %265 = vrot.lane.b32.xlu0 %v264_v14, %s505_s26  ;;  %v5_v43 = vsel %vm4_vm3, %v3_v42, %v2_v41  ;;  %v409_v44 = vld [vmem:[%s878_s0 + $0x40] ss:$8 sm:$0xf]  }
  0x28   :  { %v410_v45 = vld [vmem:[%s878_s0 + $0x40] ss:$8 sm:$0xf0]   ;;  %7 = vst.msk [vmem:[%s879_s1] ss:$8 sm:$0x3] %vm6_vm4, %v5_v43  }
  0x29   :  { %406 = vst.msk [vmem:[%s879_s1 - $0xf] ss:$8 sm:$0xc] %vm6_vm4, %v5_v43   ;;  %v19_v46 = vsel %vm4_vm3, %v410_v45, %v409_v44  ;;  %v415_v47 = vld [vmem:[%s878_s0 + $0x80] ss:$8 sm:%s30_s21]  }
  0x2a   :  { %340 = vrot.lane.b32.xlu1 %v339_v21, %s506_s10  ;;  %242 = vrot.lane.b32.xlu2 %v459_v22, %s504_s12  ;;  %407 = vst.msk [vmem:[%s879_s1 - $0x1e] ss:$8 sm:$0x30] %vm6_vm4, %v5_v43  }
  0x2b   :  { %408 = vst.msk [vmem:[%s879_s1 - $0x2d] ss:$8 sm:$0xc0] %vm6_vm4, %v5_v43  }
  0x2c   :  { %411 = vst.msk [vmem:[%s879_s1 + $0x4] ss:$8 sm:$0x3] %vm6_vm4, %v19_v46  }
  0x2d   :  { %412 = vst.msk [vmem:[%s879_s1 - $0xb] ss:$8 sm:$0xc] %vm6_vm4, %v19_v46  }
  0x2e   :  { %413 = vst.msk [vmem:[%s879_s1 - $0x1a] ss:$8 sm:$0x30] %vm6_vm4, %v19_v46  }
  0x2f   :  { %318 = vrot.lane.b32.xlu0 %v317_v29, %s506_s10  ;;  %414 = vst.msk [vmem:[%s879_s1 - $0x29] ss:$8 sm:$0xc0] %vm6_vm4, %v19_v46  }
  0x30   :  { %416 = vst.msk [vmem:[%s879_s1 + $0x10] ss:$8 sm:$0x3] %vm6_vm4, %v415_v47  }
  0x32   :  { %393 = vrot.lane.b32.xlu1 %v392_v34, %s507_s27  ;;  %295 = vrot.lane.b32.xlu2 %v470_v35, %s505_s26  ;;  %s346_s26 = smov 3 }
  0x33   :  { %v481_v39 = vld [vmem:[%s878_s0 + $0x82] ss:$8 sm:%s346_s26]  }
  0x37   :  { %371 = vrot.lane.b32.xlu0 %v370_v38, %s507_s27 }
  0x3a   :  { %348 = vrot.lane.b32.xlu2 %v481_v39, %s506_s10 }
  0x42   :  { %401 = vrot.lane.b32.xlu2 %v492_v40, %s507_s27 }
  0x6c   :  { %v129_v48 = vpop.permute.xlu2 %128  }
  0x74   :  { %v84_v49 = vpop.permute.xlu1 %83   ;;  %v137_v50 = vpop.permute.xlu2 %136  }
  0x75   :  { %427 = vst.msk [vmem:[%s879_s1 + $0x10] ss:$8 sm:$0x3] %vm55_vm5, %v84_v49  }
  0x76   :  { %438 = vst.msk [vmem:[%s879_s1 + $0x10] ss:$8 sm:$0x3] %vm108_vm6, %v137_v50  }
  0x79   :  { %v54_v51 = vpop.permute.xlu0 %53  }
  0x7a   :  { %56 = vst.msk [vmem:[%s879_s1] sm:$0xff] %vm55_vm5, %v54_v51  }
  0x7c   :  { %v107_v52 = vpop.permute.xlu1 %106   ;;  %v190_v53 = vpop.permute.xlu2 %189  }
  0x7d   :  { %109 = vst.msk [vmem:[%s879_s1] sm:$0xff] %vm108_vm6, %v107_v52  }
  0x7e   :  { %449 = vst.msk [vmem:[%s879_s1 + $0x10] ss:$8 sm:$0x3] %vm161_vm7, %v190_v53  }
  0x81   :  { %v76_v54 = vpop.permute.xlu0 %75  }
  0x82   :  { %425 = vst.msk [vmem:[%s879_s1 + $0x8] sm:$0xff] %vm55_vm5, %v76_v54  }
  0x83   :  { %436 = vst.msk [vmem:[%s879_s1 + $0x8] sm:$0xff] %vm108_vm6, %v129_v48  }
  0x84   :  { %v182_v55 = vpop.permute.xlu1 %181   ;;  %v243_v56 = vpop.permute.xlu2 %242  }
  0x85   :  { %447 = vst.msk [vmem:[%s879_s1 + $0x8] sm:$0xff] %vm161_vm7, %v182_v55  }
  0x86   :  { %460 = vst.msk [vmem:[%s879_s1 + $0x10] ss:$8 sm:$0x3] %vm214_vm8, %v243_v56  }
  0x89   :  { %v160_v57 = vpop.permute.xlu0 %159  }
  0x8a   :  { %162 = vst.msk [vmem:[%s879_s1] sm:$0xff] %vm161_vm7, %v160_v57  }
  0x8c   :  { %v235_v58 = vpop.permute.xlu1 %234   ;;  %v296_v59 = vpop.permute.xlu2 %295  }
  0x8d   :  { %458 = vst.msk [vmem:[%s879_s1 + $0x8] sm:$0xff] %vm214_vm8, %v235_v58  }
  0x8e   :  { %471 = vst.msk [vmem:[%s879_s1 + $0x10] ss:$8 sm:$0x3] %vm267_vm9, %v296_v59  }
  0x91   :  { %v213_v60 = vpop.permute.xlu0 %212  }
  0x92   :  { %215 = vst.msk [vmem:[%s879_s1] sm:$0xff] %vm214_vm8, %v213_v60  }
  0x94   :  { %v288_v61 = vpop.permute.xlu1 %287   ;;  %v349_v62 = vpop.permute.xlu2 %348  }
  0x95   :  { %469 = vst.msk [vmem:[%s879_s1 + $0x8] sm:$0xff] %vm267_vm9, %v288_v61  }
  0x96   :  { %482 = vst.msk [vmem:[%s879_s1 + $0x10] ss:$8 sm:$0x3] %vm320_vm10, %v349_v62  }
  0x99   :  { %v266_v63 = vpop.permute.xlu0 %265  }
  0x9a   :  { %268 = vst.msk [vmem:[%s879_s1] sm:$0xff] %vm267_vm9, %v266_v63  }
  0x9c   :  { %v341_v0 = vpop.permute.xlu1 %340   ;;  %v402_v1 = vpop.permute.xlu2 %401  }
  0x9d   :  { %480 = vst.msk [vmem:[%s879_s1 + $0x8] sm:$0xff] %vm320_vm10, %v341_v0  }
  0x9e   :  { %493 = vst.msk [vmem:[%s879_s1 + $0x10] ss:$8 sm:$0x3] %vm373_vm11, %v402_v1  }
  0xa1   :  { %v319_v2 = vpop.permute.xlu0 %318  }
  0xa2   :  { %321 = vst.msk [vmem:[%s879_s1] sm:$0xff] %vm320_vm10, %v319_v2  }
  0xa4   :  { %v394_v3 = vpop.permute.xlu1 %393  }
  0xa5   :  { %491 = vst.msk [vmem:[%s879_s1 + $0x8] sm:$0xff] %vm373_vm11, %v394_v3  }
  0xa9   :  { %v372_v4 = vpop.permute.xlu0 %371  }
  0xaa   :  { %374 = vst.msk [vmem:[%s879_s1] sm:$0xff] %vm373_vm11, %v372_v4  }

// kernel: bottleneck_forward.1
= control target key start
LH: loop header
LB: loop body
LE: loop exit
PB: predicated region body
PF: predicated region fallthrough
CT: control target
= control target key end

     0   :  { %s1073_s18 = smov 0   ;;  %s1075_s19 = smov 0   ;;  %s1807_s0 = inlined_call_operand.vmem [shape: f32[2,16,1,256], index: 0, kind: input, shape index: {}]   ;;  %s1808_s1 = inlined_call_operand.vmem [shape: f32[9,256], index: 1, kind: input, shape index: {}]   ;;  %s1809_s2 = inlined_call_operand.vmem [shape: f32[1,256], index: 2, kind: input, shape index: {}]   ;;  %s1810_s3 = inlined_call_operand.vmem [shape: f32[256,256], index: 3, kind: input, shape index: {}]   ;;  %s1811_s4 = inlined_call_operand.vmem [shape: f32[1,256], index: 4, kind: input, shape index: {}]   ;;  %s1812_s5 = inlined_call_operand.vmem [shape: f32[2,16,1,256], index: 5, kind: output, shape index: {}]  }
   0x1   :  { %s1077_s20 = smov 0  }
   0x2 LB: > { %s27_s21 = sadd.s32 1, %s1035_s19  ;;  %p984_p0 = scmp.ge.s32.totalorder %s1039_s20, 1  ;;  %s1039_s20 = sphi %s1077_s20, %s15_s20   ;;  %s1035_s19 = sphi %s1075_s19, %s1836_s19   ;;  %s1031_s18 = sphi %s1073_s18, %s1835_s18  }
   0x3   : > { %p29_p1 = scmp.ge.s32.totalorder %s27_s21, 2  ;;  %p208_p2 = scmp.lt.s32.totalorder %s1039_s20, 3 }
   0x5   : > { %s1838_s21 = smov (%p29_p1, %s27_s21), 0  ;;  %p209_p3 = pnand %p984_p0, %p208_p2 }
   0x6   : > { %p245_p4 = scmp.lt.s32.totalorder (!%p209_p3), %s1031_s18, 1  ;;  %s1041_s26 = smov (!%p209_p3), 16  }
   0x7   : > { %212 = sbr.rel (%p209_p3) target bundleno = 358 (0x166), region = 40  ;;  %s1042_s27 = smov (!%p209_p3), 112  }
   0xc   : > { %s1840_s18 = smov (!%p245_p4, %s1031_s18), 1  ;;  %vm331_vm0 = vcmask 1040384   ;;  %v648_v26 = vld [vmem:[%s1810_s3 + $0xf0] sm:$0xff]  ;;  %v649_v28 = vld [vmem:[%s1810_s3 + $0xf8] sm:$0xff]  ;;  %v646_v30 = vld [vmem:[%s1810_s3 + $0xe0] sm:$0xff]  ;;  %v1813_v56 = vlaneseq  ;;  %vm420_vm3 = vcmask 1046528  }
   0xd   : > { %s985_s22 = sshll.u32 %s1840_s18, 5  ;;  %v680_v27 = vld [vmem:[%s1810_s3 + $0x1f0] sm:$0xff]  ;;  %688 = vmatpush.msra.mxu0 %v648_v26  ;;  %v681_v29 = vld [vmem:[%s1810_s3 + $0x1f8] sm:$0xff]  ;;  %734 = vmatpush.msra.mxu2 %v649_v28  ;;  %v678_v31 = vld [vmem:[%s1810_s3 + $0x1e0] sm:$0xff]  ;;  %vm517_vm4 = vcmask 1045504   ;;  %vm822_vm5 = vcmask 1041409  }
   0xe   : > { %s1099_s25 = scalar_lea.vmem %s1807_s0, %s985_s22  ;;  %711 = vmatpush.msra.mxu1 %v680_v27  ;;  %757 = vmatpush.msra.mxu3 %v681_v29  ;;  %v647_v32 = vld [vmem:[%s1810_s3 + $0xe8] sm:$0xff]  ;;  %v644_v34 = vld [vmem:[%s1810_s3 + $0xd0] sm:$0xff]  ;;  %v645_v36 = vld [vmem:[%s1810_s3 + $0xd8] sm:$0xff]  ;;  %vm825_vm6 = vcmask 1042434   ;;  %vm828_vm7 = vcmask 1043459   ;;  %s1732_s30 = scalar_lea.vmem %s1812_s5, %s985_s22  ;;  %vm831_vm9 = vcmask 1044484  }
   0xf   : > { %v264_v0 = vld [vmem:[%s1099_s25] sm:$0x3]  ;;  %v265_v1 = vld [vmem:[%s1099_s25 + $0x2] sm:$0x3]  ;;  %v266_v2 = vld [vmem:[%s1099_s25 + $0x4] sm:$0x3]  ;;  %689 = vmatpush.msra.mxu0 %v646_v30  ;;  %735 = vmatpush.msra.mxu2 %v647_v32 }
  0x10   : > { %v267_v3 = vld [vmem:[%s1099_s25 + $0x6] sm:$0x3]  ;;  %297 = vst [vmem:[#allocation1 + $0x1] ss:$9 sm:$0xff] %v264_v0  ;;  %v268_v4 = vld [vmem:[%s1099_s25 + $0x8] sm:$0x3]  ;;  %712 = vmatpush.msra.mxu1 %v678_v31 }
  0x11   : > { %299 = vst [vmem:[#allocation1 + $0x2] ss:$9 sm:$0xff] %v265_v1  ;;  %v269_v5 = vld [vmem:[%s1099_s25 + $0xa] sm:$0x3]  ;;  %v270_v6 = vld [vmem:[%s1099_s25 + $0xc] sm:$0x3]  ;;  %690 = vmatpush.msra.mxu0 %v644_v34  ;;  %736 = vmatpush.msra.mxu2 %v645_v36 }
  0x12   : > { %301 = vst [vmem:[#allocation1 + $0x3] ss:$9 sm:$0xff] %v266_v2  ;;  %v271_v7 = vld [vmem:[%s1099_s25 + $0xe] sm:$0x3]  ;;  %v1110_v8 = vld [vmem:[%s1099_s25 + $0x10] sm:$0x3] }
  0x13   : > { %303 = vst [vmem:[#allocation1 + $0x4] ss:$9 sm:$0xff] %v267_v3  ;;  %v1113_v11 = vld [vmem:[%s1099_s25 + $0x12] sm:$0x3]  ;;  %v1119_v13 = vld [vmem:[%s1099_s25 + $0x14] sm:$0x3] }
  0x14   : > { %305 = vst [vmem:[#allocation1 + $0x5] ss:$9 sm:$0xff] %v268_v4  ;;  %v1124_v14 = vld [vmem:[%s1099_s25 + $0x16] sm:$0x3]  ;;  %v1130_v15 = vld [vmem:[%s1099_s25 + $0x18] sm:$0x3] }
  0x15   : > { %307 = vst [vmem:[#allocation1 + $0x6] ss:$9 sm:$0xff] %v269_v5  ;;  %v1134_v16 = vld [vmem:[%s1099_s25 + $0x1a] sm:$0x3]  ;;  %v1138_v17 = vld [vmem:[%s1099_s25 + $0x1c] sm:$0x3] }
  0x16   : > { %309 = vst [vmem:[#allocation1 + $0x7] ss:$9 sm:$0xff] %v270_v6  ;;  %v1152_v19 = vld [vmem:[%s1099_s25 + $0x1e] sm:$0x3]  ;;  %v679_v33 = vld [vmem:[%s1810_s3 + $0x1e8] sm:$0xff]  ;;  %v676_v35 = vld [vmem:[%s1810_s3 + $0x1d0] sm:$0xff] }
  0x17   : > { %758 = vmatpush.msra.mxu3 %v679_v33  ;;  %713 = vmatpush.msra.mxu1 %v676_v35  ;;  %v677_v37 = vld [vmem:[%s1810_s3 + $0x1d8] sm:$0xff]  ;;  %v642_v38 = vld [vmem:[%s1810_s3 + $0xc0] sm:$0xff]  ;;  %v643_v40 = vld [vmem:[%s1810_s3 + $0xc8] sm:$0xff]  ;;  %vm834_vm10 = vcmask 1045509   ;;  %vm837_vm11 = vcmask 1046534  }
  0x18   : > { %v674_v39 = vld [vmem:[%s1810_s3 + $0x1c0] sm:$0xff]  ;;  %691 = vmatpush.msra.mxu0 %v642_v38  ;;  %v675_v41 = vld [vmem:[%s1810_s3 + $0x1c8] sm:$0xff]  ;;  %737 = vmatpush.msra.mxu2 %v643_v40  ;;  %v640_v43 = vld [vmem:[%s1810_s3 + $0xb0] sm:$0xff] }
  0x19   : > { %759 = vmatpush.msra.mxu3 %v677_v37  ;;  %714 = vmatpush.msra.mxu1 %v674_v39  ;;  %v1232_v42 = vld [vmem:[%s1808_s1] sm:$0xff]  ;;  %v672_v44 = vld [vmem:[%s1810_s3 + $0x1b0] sm:$0xff]  ;;  %v641_v45 = vld [vmem:[%s1810_s3 + $0xb8] sm:$0xff] }
  0x1a   : > { %692 = vmatpush.msra.mxu0 %v640_v43  ;;  %v673_v46 = vld [vmem:[%s1810_s3 + $0x1b8] sm:$0xff]  ;;  %v638_v47 = vld [vmem:[%s1810_s3 + $0xa0] sm:$0xff]  ;;  %v1255_v49 = vld [vmem:[%s1808_s1 + $0x8] sm:$0xff]  ;;  %738 = vmatpush.msra.mxu2 %v641_v45  ;;  %v1266_v53 = vperm.slane %v1232_v42, 4  ;;  %v1815_v43 = vperm.slane %v1232_v42, 2  ;;  %v386_v45 = vperm.slane %v1232_v42, 1 }
  0x1b   : > { %760 = vmatpush.msra.mxu3 %v675_v41  ;;  %715 = vmatpush.msra.mxu1 %v672_v44  ;;  %v670_v48 = vld [vmem:[%s1810_s3 + $0x1a0] sm:$0xff]  ;;  %v639_v51 = vld [vmem:[%s1810_s3 + $0xa8] sm:$0xff]  ;;  %v1269_v54 = vperm.slane %v1255_v49, 4  ;;  %v636_v57 = vld [vmem:[%s1810_s3 + $0x90] sm:$0xff]  ;;  %v1286_v61 = vperm.slane %v1255_v49, 7 }
  0x1c   : > { %v671_v52 = vld [vmem:[%s1810_s3 + $0x1a8] sm:$0xff]  ;;  %693 = vmatpush.msra.mxu0 %v638_v47  ;;  %739 = vmatpush.msra.mxu2 %v639_v51  ;;  %v668_v58 = vld [vmem:[%s1810_s3 + $0x190] sm:$0xff]  ;;  %v637_v59 = vld [vmem:[%s1810_s3 + $0x98] sm:$0xff]  ;;  %v1392_v51 = vperm.slane %v1232_v42, 5 }
  0x1d   : > { %v310_v9 = vld [vmem:[#allocation1] sm:$0xff]  ;;  %v311_v10 = vld [vmem:[#allocation1 + $0x9] sm:$0xff]  ;;  %761 = vmatpush.msra.mxu3 %v673_v46  ;;  %716 = vmatpush.msra.mxu1 %v670_v48  ;;  %v669_v60 = vld [vmem:[%s1810_s3 + $0x198] sm:$0xff]  ;;  %v1814_v48 = vperm.slane %v1255_v49, 2 }
  0x1e   : > { %v1116_v12 = vsel %vm331_vm0, 0.0, %v310_v9  ;;  %312 = vst [vmem:[#allocation1] ss:$9 sm:$0xff] %v271_v7  ;;  %v1144_v18 = vsel %vm331_vm0, 0.0, %v311_v10  ;;  %694 = vmatpush.msra.mxu0 %v636_v57  ;;  %740 = vmatpush.msra.mxu2 %v637_v59  ;;  %v634_v62 = vld [vmem:[%s1810_s3 + $0x80] sm:$0xff]  ;;  %v1324_v9 = vand.u32 127, %v1813_v56 }
  0x1f   : > { %336 = vrot.lane.b32.xlu0 %v1116_v12, %s1041_s26  ;;  %313 = vst [vmem:[#allocation1 + $0x1] ss:$9 sm:$0xff] %v1110_v8  ;;  %357 = vrot.lane.b32.xlu2 %v1116_v12, %s1042_s27  ;;  %v666_v63 = vld [vmem:[%s1810_s3 + $0x180] sm:$0xff]  ;;  %v632_v10 = vld [vmem:[%s1810_s3 + $0x70] sm:$0xff]  ;;  %v1388_v47 = vmul.f32 %v1286_v61, %v1144_v18 }
  0x20   : > { %314 = vst [vmem:[#allocation1 + $0x2] ss:$9 sm:$0xff] %v1113_v11  ;;  %762 = vmatpush.msra.mxu3 %v671_v52  ;;  %717 = vmatpush.msra.mxu1 %v668_v58  ;;  %v665_v26 = vld [vmem:[%s1810_s3 + $0x178] sm:$0xff]  ;;  %v630_v27 = vld [vmem:[%s1810_s3 + $0x60] sm:$0xff]  ;;  %v663_v29 = vld [vmem:[%s1810_s3 + $0x168] sm:$0xff]  ;;  %vm369_vm1 = vcmp.lt.s32.totalorder %v1324_v9, 112 }
  0x21   : > { %315 = vst [vmem:[#allocation1 + $0x3] ss:$9 sm:$0xff] %v1119_v13  ;;  %695 = vmatpush.msra.mxu0 %v634_v62  ;;  %v662_v28 = vld [vmem:[%s1810_s3 + $0x160] sm:$0xff]  ;;  %v628_v37 = vld [vmem:[%s1810_s3 + $0x50] sm:$0xff]  ;;  %v629_v39 = vld [vmem:[%s1810_s3 + $0x58] sm:$0xff]  ;;  %v387_v52 = vperm.slane %v1255_v49, 1 }
  0x22   : > { %316 = vst [vmem:[#allocation1 + $0x4] ss:$9 sm:$0xff] %v1124_v14  ;;  %763 = vmatpush.msra.mxu3 %v669_v60  ;;  %718 = vmatpush.msra.mxu1 %v666_v63  ;;  %v660_v38 = vld [vmem:[%s1810_s3 + $0x150] sm:$0xff]  ;;  %v661_v46 = vld [vmem:[%s1810_s3 + $0x158] sm:$0xff]  ;;  %v626_v57 = vld [vmem:[%s1810_s3 + $0x40] sm:$0xff]  ;;  %v1405_v60 = vperm.slane %v1255_v49, 5 }
  0x23   : > { %317 = vst [vmem:[#allocation1 + $0x5] ss:$9 sm:$0xff] %v1130_v15  ;;  %696 = vmatpush.msra.mxu0 %v632_v10  ;;  %v1380_v44 = vld [vmem:[%s1808_s1 + $0x10] ss:$0 sm:$0xff]  ;;  %v658_v58 = vld [vmem:[%s1810_s3 + $0x140] sm:$0xff]  ;;  %v627_v59 = vld [vmem:[%s1810_s3 + $0x48] sm:$0xff] }
  0x24   : > { %318 = vst [vmem:[#allocation1 + $0x6] ss:$9 sm:$0xff] %v1134_v16  ;;  %v1410_v62 = vld [vmem:[%s1808_s1 + $0x18] ss:$0 sm:$0xff]  ;;  %vm350_vm2 = vcmp.lt.s32.totalorder %v1324_v9, 16  ;;  %v619_v34 = vld [vmem:[%s1810_s3 + $0x8] sm:$0xff] }
  0x25   : > { %319 = vst [vmem:[#allocation1 + $0x7] ss:$9 sm:$0xff] %v1138_v17  ;;  %697 = vmatpush.msra.mxu0 %v630_v27  ;;  %v624_v27 = vld [vmem:[%s1810_s3 + $0x30] sm:$0xff]  ;;  %v621_v56 = vld [vmem:[%s1810_s3 + $0x18] sm:$0xff]  ;;  %v553_v32 = vrot.slane %v1388_v47, 2 }
  0x27   : > { %342 = vrot.lane.b32.xlu0 %v1144_v18, %s1041_s26  ;;  %363 = vrot.lane.b32.xlu2 %v1144_v18, %s1042_s27 }
  0x28   : > { %698 = vmatpush.msra.mxu0 %v628_v37 }
  0x2a   : > { %699 = vmatpush.msra.mxu0 %v626_v57  ;;  %v1475_v57 = vperm.slane %v1255_v49, 6 }
  0x2c   : > { %v1154_v20 = vld [vmem:[#allocation1] sm:$0xff]  ;;  %v1156_v21 = vld [vmem:[#allocation1 + $0x9] sm:$0xff]  ;;  %700 = vmatpush.msra.mxu0 %v624_v27 }
  0x2d   : > { %338 = vrot.lane.b32.xlu1 %v1154_v20, %s1041_s26  ;;  %322 = vst [vmem:[#allocation1] ss:$9 sm:$0xff] %v1152_v19  ;;  %v1453_v37 = vmul.f32 %v1266_v53, %v1154_v20 }
  0x2f   : > { %359 = vrot.lane.b32.xlu0 %v1154_v20, %s1042_s27 }
  0x34   : > { %v324_v22 = vld [vmem:[#allocation1 + $0x9] sm:$0xff]  ;;  %v323_v23 = vld [vmem:[#allocation1] sm:$0xff] }
  0x35   : > { %344 = vrot.lane.b32.xlu1 %v1156_v21, %s1041_s26  ;;  %v1166_v24 = vsel %vm331_vm0, %v324_v22, 0.0  ;;  %780 = vst [vmem:[#allocation1] ss:$9 sm:$0xff] %v264_v0  ;;  %v1169_v25 = vsel %vm331_vm0, %v323_v23, 0.0  ;;  %v635_v0 = vld [vmem:[%s1810_s3 + $0x88] sm:$0xff]  ;;  %v664_v22 = vld [vmem:[%s1810_s3 + $0x170] sm:$0xff] }
  0x36   : > { %782 = vst [vmem:[#allocation1 + $0x1] ss:$9 sm:$0xff] %v265_v1  ;;  %340 = vrot.lane.b32.xlu2 %v1169_v25, %s1041_s26  ;;  %v1298_v1 = vperm.slane %v1232_v42, 7  ;;  %741 = vmatpush.msra.mxu2 %v635_v0  ;;  %v633_v23 = vld [vmem:[%s1810_s3 + $0x78] sm:$0xff]  ;;  %v380_v0 = vperm.slane %v1232_v42, 0 }
  0x37   : > { %346 = vrot.lane.b32.xlu0 %v1166_v24, %s1041_s26  ;;  %784 = vst [vmem:[#allocation1 + $0x2] ss:$9 sm:$0xff] %v266_v2  ;;  %v1302_v2 = vmul.f32 %v1266_v53, %v1116_v12  ;;  %719 = vmatpush.msra.mxu1 %v664_v22  ;;  %v381_v22 = vperm.slane %v1255_v49, 0 }
  0x38   : > { %786 = vst [vmem:[#allocation1 + $0x3] ss:$9 sm:$0xff] %v267_v3  ;;  %v1306_v3 = vmul.f32 %v1269_v54, %v1144_v18  ;;  %742 = vmatpush.msra.mxu2 %v633_v23  ;;  %v1373_v40 = vmul.f32 %v1298_v1, %v1116_v12  ;;  %v1425_v23 = vperm.slane %v1232_v42, 3 }
  0x39   : > { %788 = vst [vmem:[#allocation1 + $0x4] ss:$9 sm:$0xff] %v268_v4  ;;  %v1310_v4 = vmul.f32 %v1269_v54, %v1166_v24  ;;  %v453_v30 = vrot.slane %v1302_v2, 1  ;;  %720 = vmatpush.msra.mxu1 %v662_v28  ;;  %v656_v28 = vld [vmem:[%s1810_s3 + $0x130] sm:$0xff] }
  0x3a   : > { %790 = vst [vmem:[#allocation1 + $0x5] ss:$9 sm:$0xff] %v269_v5  ;;  %v667_v5 = vld [vmem:[%s1810_s3 + $0x188] sm:$0xff]  ;;  %v456_v31 = vrot.slane %v1306_v3, 1 }
  0x3b   : > { %792 = vst [vmem:[#allocation1 + $0x6] ss:$9 sm:$0xff] %v270_v6  ;;  %v1317_v6 = vmul.f32 %v1286_v61, %v1166_v24  ;;  %764 = vmatpush.msra.mxu3 %v667_v5  ;;  %721 = vmatpush.msra.mxu1 %v660_v38  ;;  %v659_v5 = vld [vmem:[%s1810_s3 + $0x148] sm:$0xff]  ;;  %v657_v38 = vld [vmem:[%s1810_s3 + $0x138] sm:$0xff] }
  0x3c   : > { %794 = vst [vmem:[#allocation1 + $0x7] ss:$9 sm:$0xff] %v271_v7  ;;  %v1321_v7 = vmul.f32 %v1266_v53, %v1169_v25  ;;  %v1472_v53 = vmul.f32 %v387_v52, %v1144_v18  ;;  %v1488_v18 = vmul.f32 %v1298_v1, %v1154_v20 }
  0x3d   : > { %365 = vrot.lane.b32.xlu1 %v1156_v21, %s1042_s27  ;;  %765 = vmatpush.msra.mxu3 %v665_v26  ;;  %v1428_v26 = vperm.slane %v1255_v49, 3 }
  0x3e   : > { %367 = vrot.lane.b32.xlu2 %v1166_v24, %s1042_s27  ;;  %v1337_v24 = vmul.f32 %v1298_v1, %v1169_v25  ;;  %722 = vmatpush.msra.mxu1 %v658_v58  ;;  %v623_v58 = vld [vmem:[%s1810_s3 + $0x28] sm:$0xff]  ;;  %v1504_v1 = vmul.f32 %v1286_v61, %v1156_v21  ;;  %v653_v61 = vld [vmem:[%s1810_s3 + $0x118] sm:$0xff] }
  0x3f   : > { %766 = vmatpush.msra.mxu3 %v663_v29  ;;  %v1445_v29 = vmul.f32 %v386_v45, %v1116_v12  ;;  %v654_v12 = vld [vmem:[%s1810_s3 + $0x120] sm:$0xff] }
  0x40   : > { %723 = vmatpush.msra.mxu1 %v656_v28 }
  0x41   : > { %767 = vmatpush.msra.mxu3 %v661_v46 }
  0x42   : > { %724 = vmatpush.msra.mxu1 %v654_v12 }
  0x43   : > { %768 = vmatpush.msra.mxu3 %v659_v5  ;;  %v620_v5 = vld [vmem:[%s1810_s3 + $0x10] sm:$0xff] }
  0x45   : > { %361 = vrot.lane.b32.xlu1 %v1169_v25, %s1042_s27  ;;  %v631_v25 = vld [vmem:[%s1810_s3 + $0x68] sm:$0xff]  ;;  %769 = vmatpush.msra.mxu3 %v657_v38 }
  0x46   : > { %743 = vmatpush.msra.mxu2 %v631_v25  ;;  %v1440_v25 = vperm.slane %v1232_v42, 6 }
  0x48   : > { %744 = vmatpush.msra.mxu2 %v629_v39  ;;  %v622_v39 = vld [vmem:[%s1810_s3 + $0x20] sm:$0xff] }
  0x49   : > { %701 = vmatpush.msra.mxu0 %v622_v39 }
  0x4a   : > { %745 = vmatpush.msra.mxu2 %v627_v59  ;;  %v655_v59 = vld [vmem:[%s1810_s3 + $0x128] sm:$0xff] }
  0x4b   : > { %770 = vmatpush.msra.mxu3 %v655_v59  ;;  %702 = vmatpush.msra.mxu0 %v620_v5 }
  0x4d   : > { %771 = vmatpush.msra.mxu3 %v653_v61 }
  0x79   : > { %v1257_v50 = vpop.permute.xlu2 %357 }
  0x81   : > { %v364_v35 = vpop.permute.xlu2 %363 }
  0x82   : > { %v370_v63 = vsel %vm369_vm1, %v1257_v50, %v364_v35  ;;  %v373_v10 = vsel %vm369_vm1, %v364_v35, %v1257_v50  ;;  %v625_v50 = vld [vmem:[%s1810_s3 + $0x38] sm:$0xff]  ;;  %v1449_v35 = vmul.f32 %v1269_v54, %v1156_v21 }
  0x83   : > { %v1465_v54 = vmul.f32 %v1392_v51, %v370_v63  ;;  %746 = vmatpush.msra.mxu2 %v625_v50  ;;  %v1491_v27 = vmul.f32 %v1405_v60, %v373_v10  ;;  %v1494_v28 = vmul.f32 %v1380_v44, %v370_v63  ;;  %v652_v50 = vld [vmem:[%s1810_s3 + $0x110] sm:$0xff]  ;;  %v1508_v33 = vmul.f32 %v1815_v43, %v370_v63  ;;  %v618_v63 = vld [vmem:[%s1810_s3] sm:$0xff] }
  0x84   : > { %v1512_v38 = vmul.f32 %v1814_v48, %v373_v10  ;;  %v1515_v39 = vmul.f32 %v1410_v62, %v373_v10  ;;  %v457_v12 = vrot.slane %v1449_v35, 1  ;;  %v650_v43 = vld [vmem:[%s1810_s3 + $0x100] sm:$0xff]  ;;  %725 = vmatpush.msra.mxu1 %v652_v50  ;;  %v550_v35 = vrot.slane %v1373_v40, 2  ;;  %703 = vmatpush.msra.mxu0 %v618_v63 }
  0x85   : > { %747 = vmatpush.msra.mxu2 %v623_v58  ;;  %v454_v58 = vrot.slane %v1453_v37, 1  ;;  %v1817_v37 = vrot.slane %v1488_v18, 2  ;;  %v390_v50 = vmul.f32 %v386_v45, %v1154_v20  ;;  %v1819_v45 = vrot.slane %v1321_v7, 1 }
  0x86   : > { %726 = vmatpush.msra.mxu1 %v650_v43  ;;  %v458_v63 = vsel %vm420_vm3, %v456_v31, %v457_v12 }
  0x87   : > { %748 = vmatpush.msra.mxu2 %v621_v56  ;;  %v455_v56 = vsel %vm420_vm3, %v453_v30, %v454_v58  ;;  %v1581_v3 = vsel %vm420_vm3, %v454_v58, %v1819_v45  ;;  %v1586_v2 = vsel %vm517_vm4, %v550_v35, %v1817_v37 }
  0x89   : > { %749 = vmatpush.msra.mxu2 %v619_v34  ;;  %v1818_v34 = vrot.slane %v1310_v4, 1 }
  0x8b   : > { %v1576_v43 = vsel %vm420_vm3, %v457_v12, %v1818_v34 }
  0x90   : > { %v341_v20 = vpop.permute.xlu2 %340 }
  0x91   : > { %v1271_v55 = vpop.permute.xlu0 %336 }
  0x99   : > { %v1360_v36 = vpop.permute.xlu0 %342 }
  0x9a   : > { %v351_v48 = vsel %vm350_vm2, %v1271_v55, %v1360_v36  ;;  %v354_v10 = vsel %vm350_vm2, %v1360_v36, %v1271_v55  ;;  %v391_v55 = vmul.f32 %v387_v52, %v1156_v21  ;;  %v651_v36 = vld [vmem:[%s1810_s3 + $0x108] sm:$0xff]  ;;  %v1816_v21 = vrot.slane %v1504_v1, 2 }
  0x9b   : > { %v382_v52 = vmul.f32 %v380_v0, %v354_v10  ;;  %v383_v40 = vmul.f32 %v381_v22, %v351_v48  ;;  %v408_v61 = vmul.f32 %v1425_v23, %v354_v10  ;;  %v409_v47 = vmul.f32 %v1428_v26, %v351_v48  ;;  %772 = vmatpush.msra.mxu3 %v651_v36 }
  0x9c   : > { %v1571_v5 = vmul.f32 %v1440_v25, %v354_v10  ;;  %v1589_v30 = vmul.f32 %v1475_v57, %v351_v48  ;;  %v1600_v7 = vsel %vm517_vm4, %v553_v32, %v1816_v21 }
  0x9d   : > { %v392_v10 = vadd.f32 %v1445_v29, %v382_v52  ;;  %v393_v12 = vadd.f32 %v1472_v53, %v383_v40  ;;  %v421_v35 = vrot.slane %v408_v61, 1  ;;  %v424_v34 = vrot.slane %v409_v47, 1  ;;  %v1617_v52 = vld [vmem:[%s1809_s2] sm:$0x3] }
  0x9e   : > { %v518_v40 = vrot.slane %v1571_v5, 2  ;;  %v521_v61 = vrot.slane %v1589_v30, 2  ;;  %v602_v5 = vperm.slane %v1617_v52, 0 }
  0x9f   : > { %v1467_v46 = vpop.permute.xlu1 %338 }
  0xa1   : > { %v1517_v41 = vpop.permute.xlu0 %359 }
  0xa7   : > { %v345_v59 = vpop.permute.xlu1 %344 }
  0xa8   : > { %v352_v4 = vsel %vm350_vm2, %v1467_v46, %v345_v59  ;;  %v355_v31 = vsel %vm350_vm2, %v345_v59, %v1467_v46 }
  0xa9   : > { %v410_v48 = vmul.f32 %v1425_v23, %v355_v31  ;;  %v411_v58 = vmul.f32 %v1428_v26, %v352_v4  ;;  %v347_v36 = vpop.permute.xlu0 %346  ;;  %v384_v32 = vmul.f32 %v380_v0, %v355_v31  ;;  %v385_v29 = vmul.f32 %v381_v22, %v352_v4 }
  0xaa   : > { %v353_v45 = vsel %vm350_vm2, %v341_v20, %v347_v36  ;;  %v356_v46 = vsel %vm350_vm2, %v347_v36, %v341_v20  ;;  %v402_v0 = vadd.f32 %v1508_v33, %v392_v10  ;;  %v403_v36 = vadd.f32 %v1512_v38, %v393_v12 }
  0xab   : > { %v422_v53 = vrot.slane %v410_v48, 1  ;;  %v425_v59 = vrot.slane %v411_v58, 1  ;;  %v412_v47 = vmul.f32 %v1425_v23, %v356_v46  ;;  %v413_v20 = vmul.f32 %v1428_v26, %v353_v45 }
  0xac   : > { %v1628_v58 = vmul.f32 %v1440_v25, %v355_v31  ;;  %v1631_v21 = vmul.f32 %v1475_v57, %v352_v4  ;;  %v394_v30 = vadd.f32 %v390_v50, %v384_v32  ;;  %v395_v26 = vadd.f32 %v391_v55, %v385_v29 }
  0xad   : > { %v423_v22 = vsel %vm420_vm3, %v421_v35, %v422_v53  ;;  %v426_v48 = vsel %vm420_vm3, %v424_v34, %v425_v59  ;;  %v427_v12 = vrot.slane %v412_v47, 1  ;;  %v429_v4 = vrot.slane %v413_v20, 1 }
  0xae   : > { %v435_v37 = vadd.f32 %v423_v22, %v402_v0  ;;  %v436_v33 = vadd.f32 %v426_v48, %v403_v36  ;;  %v1820_v35 = vperm.slane %v1232_v42, 2  ;;  %v1821_v23 = vperm.slane %v1255_v49, 2 }
  0xaf   : > { %v366_v10 = vpop.permute.xlu1 %365  ;;  %v519_v29 = vrot.slane %v1628_v58, 2  ;;  %v522_v0 = vrot.slane %v1631_v21, 2  ;;  %v509_v20 = vmul.f32 %v1440_v25, %v356_v46  ;;  %v510_v49 = vmul.f32 %v1475_v57, %v353_v45 }
  0xb0   : > { %v371_v38 = vsel %vm369_vm1, %v1517_v41, %v366_v10  ;;  %v374_v31 = vsel %vm369_vm1, %v366_v10, %v1517_v41  ;;  %v468_v22 = vadd.f32 %v458_v63, %v436_v33  ;;  %v467_v48 = vadd.f32 %v455_v56, %v435_v37 }
  0xb1   : > { %v400_v34 = vmul.f32 %v1820_v35, %v371_v38  ;;  %v401_v50 = vmul.f32 %v1821_v23, %v374_v31  ;;  %v475_v55 = vmul.f32 %v1392_v51, %v371_v38  ;;  %v476_v32 = vmul.f32 %v1405_v60, %v374_v31 }
  0xb2   : > { %v1650_v36 = vmul.f32 %v1380_v44, %v371_v38  ;;  %v1653_v41 = vmul.f32 %v1410_v62, %v374_v31  ;;  %v428_v23 = vsel %vm420_vm3, %v422_v53, %v427_v12  ;;  %v430_v58 = vsel %vm420_vm3, %v425_v59, %v429_v4 }
  0xb3   : > { %v486_v47 = vrot.slane %v475_v55, 1  ;;  %v489_v42 = vrot.slane %v476_v32, 1  ;;  %v404_v10 = vadd.f32 %v400_v34, %v394_v30  ;;  %v405_v21 = vadd.f32 %v401_v50, %v395_v26  ;;  %v368_v32 = vpop.permute.xlu2 %367 }
  0xb4   : > { %v1822_v38 = vrot.slane %v1465_v54, 1  ;;  %v1823_v31 = vrot.slane %v1491_v27, 1  ;;  %v583_v57 = vrot.slane %v1650_v36, 2  ;;  %v586_v37 = vrot.slane %v1653_v41, 2 }
  0xb5   : > { %v520_v56 = vsel %vm517_vm4, %v518_v40, %v519_v29  ;;  %v523_v63 = vsel %vm517_vm4, %v521_v61, %v522_v0  ;;  %v437_v45 = vadd.f32 %v428_v23, %v404_v10  ;;  %v438_v53 = vadd.f32 %v430_v58, %v405_v21 }
  0xb6   : > { %v487_v35 = vsel %vm420_vm3, %v1822_v38, %v486_v47  ;;  %v490_v55 = vsel %vm420_vm3, %v1823_v31, %v489_v42  ;;  %v524_v33 = vrot.slane %v509_v20, 2  ;;  %v526_v12 = vrot.slane %v510_v49, 2 }
  0xb7   : > { %v499_v25 = vadd.f32 %v487_v35, %v467_v48  ;;  %v500_v46 = vadd.f32 %v490_v55, %v468_v22  ;;  %v362_v54 = vpop.permute.xlu1 %361  ;;  %v1824_v61 = vrot.slane %v1494_v28, 2  ;;  %v1825_v41 = vrot.slane %v1515_v39, 2 }
  0xb8   : > { %v372_v59 = vsel %vm369_vm1, %v362_v54, %v368_v32  ;;  %v375_v27 = vsel %vm369_vm1, %v368_v32, %v362_v54  ;;  %v1826_v39 = vrot.slane %v1337_v24, 2  ;;  %v1827_v58 = vrot.slane %v1488_v18, 2 }
  0xb9   : > { %v532_v30 = vadd.f32 %v520_v56, %v499_v25  ;;  %v533_v26 = vadd.f32 %v523_v63, %v500_v46  ;;  %v477_v4 = vmul.f32 %v1392_v51, %v372_v59  ;;  %v478_v34 = vmul.f32 %v1405_v60, %v375_v27 }
  0xba   : > { %v584_v50 = vsel %vm517_vm4, %v1824_v61, %v583_v57  ;;  %v587_v9 = vsel %vm517_vm4, %v1825_v41, %v586_v37  ;;  %v574_v20 = vmul.f32 %v1380_v44, %v372_v59  ;;  %v575_v51 = vmul.f32 %v1410_v62, %v375_v27 }
  0xbb   : > { %v564_v40 = vadd.f32 %v1586_v2, %v532_v30  ;;  %v565_v36 = vadd.f32 %v1600_v7, %v533_v26  ;;  %v491_v22 = vrot.slane %v477_v4, 1  ;;  %v493_v48 = vrot.slane %v478_v34, 1 }
  0xbc   : > { %v470_v60 = vadd.f32 %v1576_v43, %v438_v53  ;;  %v469_v2 = vadd.f32 %v1581_v3, %v437_v45  ;;  %v557_v10 = vsel %vm517_vm4, %v1827_v58, %v1826_v39  ;;  %v1828_v44 = vrot.slane %v1317_v6, 2 }
  0xbd   : > { %v596_v49 = vadd.f32 %v584_v50, %v564_v40  ;;  %v597_v28 = vadd.f32 %v587_v9, %v565_v36  ;;  %v492_v23 = vsel %vm420_vm3, %v486_v47, %v491_v22  ;;  %v494_v7 = vsel %vm420_vm3, %v489_v42, %v493_v48 }
  0xbe   : > { %v1829_v62 = vrot.slane %v1504_v1, 2  ;;  %v501_v21 = vadd.f32 %v492_v23, %v469_v2  ;;  %v502_v3 = vadd.f32 %v494_v7, %v470_v60  ;;  %v1830_v47 = vperm.slane %v1617_v52, 1  ;;  %v682_v52 = vld [vmem:[%s1811_s4] sm:$0x3] }
  0xbf   : > { %v606_v38 = vadd.f32 %v602_v5, %v596_v49  ;;  %v525_v24 = vsel %vm517_vm4, %v519_v29, %v524_v33  ;;  %v527_v18 = vsel %vm517_vm4, %v522_v0, %v526_v12  ;;  %v588_v35 = vrot.slane %v574_v20, 2 }
  0xc0   : > { %v559_v43 = vsel %vm517_vm4, %v1829_v62, %v1828_v44  ;;  %v607_v42 = vadd.f32 %v1830_v47, %v597_v28  ;;  %v590_v31 = vrot.slane %v575_v51, 2  ;;  %v534_v32 = vadd.f32 %v525_v24, %v501_v21 }
  0xc1   : > { %v610_v55 = vmax.f32 %v606_v38, 0.0  ;;  %v535_v1 = vadd.f32 %v527_v18, %v502_v3  ;;  %v589_v45 = vsel %vm517_vm4, %v583_v57, %v588_v35  ;;  %v1831_v59 = vmov %v1830_v47  ;;  %v795_v57 = vld [vmem:[#allocation1] sm:$0xff] }
  0xc2   : > { %v611_v6 = vmax.f32 %v607_v42, 0.0  ;;  %v566_v56 = vadd.f32 %v557_v10, %v534_v32  ;;  %v591_v53 = vsel %vm517_vm4, %v586_v37, %v590_v31  ;;  %v796_v37 = vld [vmem:[#allocation1 + $0x9] sm:$0xff] }
  0xc3   : > { %v614_v25 = vmin.f32 %v610_v55, 6.0  ;;  %v567_v63 = vadd.f32 %v559_v43, %v535_v1  ;;  %797 = vst [vmem:[#allocation1] ss:$9 sm:$0xff] %v1110_v8 }
  0xc4   : > { %v615_v46 = vmin.f32 %v611_v6, 6.0  ;;  %v598_v54 = vadd.f32 %v589_v45, %v566_v56  ;;  %798 = vst [vmem:[#allocation1 + $0x1] ss:$9 sm:$0xff] %v1113_v11  ;;  %v685_v11 = vperm.slane %v682_v52, 1 }
  0xc5   : > { %704 = vmatmul.f32.vlgmr.msra.gmra.mxu0 %v614_v25  ;;  %v599_v29 = vadd.f32 %v591_v53, %v567_v63  ;;  %750 = vmatmul.f32.vlgmr.msra.gmra.mxu2 %v614_v25  ;;  %799 = vst [vmem:[#allocation1 + $0x2] ss:$9 sm:$0xff] %v1119_v13 }
  0xc6   : > { %727 = vmatmul.f32.vlgmr.msra.gmra.mxu1 %v615_v46  ;;  %773 = vmatmul.f32.vlgmr.msra.gmra.mxu3 %v615_v46  ;;  %v608_v0 = vadd.f32 %v602_v5, %v598_v54  ;;  %800 = vst [vmem:[#allocation1 + $0x3] ss:$9 sm:$0xff] %v1124_v14  ;;  %v684_v5 = vperm.slane %v682_v52, 0 }
  0xc7   : > { %v609_v27 = vadd.f32 %v1831_v59, %v599_v29  ;;  %801 = vst [vmem:[#allocation1 + $0x4] ss:$9 sm:$0xff] %v1130_v15 }
  0xc8   : > { %v612_v30 = vmax.f32 %v608_v0, 0.0  ;;  %802 = vst [vmem:[#allocation1 + $0x5] ss:$9 sm:$0xff] %v1134_v16 }
  0xc9   : > { %v613_v26 = vmax.f32 %v609_v27, 0.0  ;;  %803 = vst [vmem:[#allocation1 + $0x6] ss:$9 sm:$0xff] %v1138_v17  ;;  %v1832_v17 = vlaneseq }
  0xca   : > { %v616_v33 = vmin.f32 %v612_v30, 6.0  ;;  %804 = vst [vmem:[#allocation1 + $0x7] ss:$9 sm:$0xff] %v1152_v19 }
  0xcb   : > { %v617_v12 = vmin.f32 %v613_v26, 6.0  ;;  %vm1723_vm8 = vcmp.lt.s32.totalorder %v1832_v17, 256 }
  0xcd   : > { %707 = vmatmul.f32.gmra.mxu0 %v616_v33  ;;  %753 = vmatmul.f32.gmra.mxu2 %v616_v33 }
  0xce   : > { %730 = vmatmul.f32.gmra.mxu1 %v617_v12  ;;  %776 = vmatmul.f32.gmra.mxu3 %v617_v12 }
  0xd1   : > { %v806_v38 = vld [vmem:[#allocation1 + $0x9] sm:$0xff]  ;;  %v805_v18 = vld [vmem:[#allocation1] sm:$0xff] }
 0x142   : > { %v705_v8 = vpop.f32.mrf.mxu0 }
 0x143   : > { %v706_v4 = vadd.f32 %v705_v8, %v684_v5  ;;  %v728_v14 = vpop.f32.mrf.mxu1 }
 0x145   : > { %v729_v15 = vadd.f32 %v728_v14, %v706_v4 }
 0x147   : > { %v811_v36 = vadd.f32 %v795_v57, %v729_v15 }
 0x148   : > { %v751_v13 = vpop.f32.mrf.mxu2 }
 0x149   : > { %v752_v34 = vadd.f32 %v751_v13, %v685_v11  ;;  %v774_v40 = vpop.f32.mrf.mxu3 }
 0x14a   : > { %v708_v50 = vpop.f32.mrf.mxu0 }
 0x14b   : > { %v775_v61 = vadd.f32 %v774_v40, %v752_v34  ;;  %v709_v9 = vadd.f32 %v708_v50, %v684_v5  ;;  %v731_v21 = vpop.f32.mrf.mxu1 }
 0x14d   : > { %v812_v16 = vadd.f32 %v796_v37, %v775_v61  ;;  %v732_v42 = vadd.f32 %v731_v21, %v709_v9 }
 0x14f   : > { %v819_v41 = vrot.slane %v812_v16, 7  ;;  %v813_v31 = vadd.f32 %v805_v18, %v732_v42 }
 0x150   : > { %v754_v60 = vpop.f32.mrf.mxu2 }
 0x151   : > { %v821_v22 = vsel %vm331_vm0, %v811_v36, %v819_v41  ;;  %v823_v48 = vsel %vm822_vm5, %v811_v36, %v819_v41  ;;  %v826_v20 = vsel %vm825_vm6, %v811_v36, %v819_v41  ;;  %v829_v51 = vsel %vm828_vm7, %v811_v36, %v819_v41  ;;  %v777_v3 = vpop.f32.mrf.mxu3 }
 0x152   : > { %v824_v2 = vrot.slane %v823_v48, 1  ;;  %v827_v49 = vrot.slane %v826_v20, 2  ;;  %v830_v28 = vrot.slane %v829_v51, 3  ;;  %v832_v23 = vsel %vm831_vm9, %v811_v36, %v819_v41  ;;  %877 = vst.msk [vmem:[%s1732_s30] sm:$0x3] %vm1723_vm8, %v821_v22 }
 0x153   : > { %v833_v7 = vrot.slane %v832_v23, 4  ;;  %v835_v39 = vsel %vm834_vm10, %v811_v36, %v819_v41  ;;  %v838_v58 = vsel %vm837_vm11, %v811_v36, %v819_v41  ;;  %v840_v10 = vsel %vm420_vm3, %v819_v41, %v811_v36 }
 0x154   : > { %v836_v44 = vrot.slane %v835_v39, 5  ;;  %878 = vst.msk [vmem:[%s1732_s30 + $0x2] sm:$0x3] %vm1723_vm8, %v824_v2  ;;  %v755_v62 = vadd.f32 %v754_v60, %v685_v11  ;;  %v839_v43 = vrot.slane %v838_v58, 6  ;;  %v841_v47 = vrot.slane %v840_v10, 7 }
 0x155   : > { %879 = vst.msk [vmem:[%s1732_s30 + $0x4] sm:$0x3] %vm1723_vm8, %v827_v49 }
 0x156   : > { %880 = vst.msk [vmem:[%s1732_s30 + $0x6] sm:$0x3] %vm1723_vm8, %v830_v28  ;;  %v778_v24 = vadd.f32 %v777_v3, %v755_v62 }
 0x157   : > { %881 = vst.msk [vmem:[%s1732_s30 + $0x8] sm:$0x3] %vm1723_vm8, %v833_v7 }
 0x158   : > { %882 = vst.msk [vmem:[%s1732_s30 + $0xa] sm:$0x3] %vm1723_vm8, %v836_v44  ;;  %v814_v35 = vadd.f32 %v806_v38, %v778_v24 }
 0x159   : > { %883 = vst.msk [vmem:[%s1732_s30 + $0xc] sm:$0x3] %vm1723_vm8, %v839_v43 }
 0x15a   : > { %884 = vst.msk [vmem:[%s1732_s30 + $0xe] sm:$0x3] %vm1723_vm8, %v841_v47  ;;  %v820_v55 = vrot.slane %v814_v35, 7 }
 0x15c   : > { %v842_v6 = vsel %vm331_vm0, %v813_v31, %v820_v55  ;;  %v843_v32 = vsel %vm822_vm5, %v813_v31, %v820_v55  ;;  %v845_v1 = vsel %vm825_vm6, %v813_v31, %v820_v55  ;;  %v847_v25 = vsel %vm828_vm7, %v813_v31, %v820_v55 }
 0x15d   : > { %v844_v46 = vrot.slane %v843_v32, 1  ;;  %v846_v56 = vrot.slane %v845_v1, 2  ;;  %v848_v63 = vrot.slane %v847_v25, 3  ;;  %v849_v45 = vsel %vm831_vm9, %v813_v31, %v820_v55  ;;  %885 = vst.msk [vmem:[%s1732_s30 + $0x10] sm:$0x3] %vm1723_vm8, %v842_v6 }
 0x15e   : > { %v850_v53 = vrot.slane %v849_v45, 4  ;;  %v851_v54 = vsel %vm834_vm10, %v813_v31, %v820_v55  ;;  %v853_v29 = vsel %vm837_vm11, %v813_v31, %v820_v55  ;;  %v855_v0 = vsel %vm420_vm3, %v820_v55, %v813_v31 }
 0x15f   : > { %v852_v59 = vrot.slane %v851_v54, 5  ;;  %886 = vst.msk [vmem:[%s1732_s30 + $0x12] sm:$0x3] %vm1723_vm8, %v844_v46  ;;  %v854_v27 = vrot.slane %v853_v29, 6  ;;  %v856_v30 = vrot.slane %v855_v0, 7 }
 0x160   : > { %887 = vst.msk [vmem:[%s1732_s30 + $0x14] sm:$0x3] %vm1723_vm8, %v846_v56 }
 0x161   : > { %888 = vst.msk [vmem:[%s1732_s30 + $0x16] sm:$0x3] %vm1723_vm8, %v848_v63 }
 0x162   : > { %889 = vst.msk [vmem:[%s1732_s30 + $0x18] sm:$0x3] %vm1723_vm8, %v850_v53 }
 0x163   : > { %890 = vst.msk [vmem:[%s1732_s30 + $0x1a] sm:$0x3] %vm1723_vm8, %v852_v59 }
 0x164   : > { %891 = vst.msk [vmem:[%s1732_s30 + $0x1c] sm:$0x3] %vm1723_vm8, %v854_v27 }
 0x165   : > { %892 = vst.msk [vmem:[%s1732_s30 + $0x1e] sm:$0x3] %vm1723_vm8, %v856_v30 }
 0x166 PF: > { %s15_s20 = sadd.s32 1, %s1039_s20   ;;  %s1835_s18 = smov %s1035_s19 }
 0x167   : > { %p12_p5 = scmp.ge.s32.totalorder %s15_s20, 4   ;;  %s1836_s19 = smov %s1838_s21 }
 0x169   :  { %14 = sbr.rel (!%p12_p5) target bundleno = 2 (0x2), region = 84 }

</bundles_post_ra>
